<compile_context>
chip_gen: v7x
topology: tpu7x:2x2x1
jax: 0.10.0
libtpu: 0.0.40
codegen_flags: <defaults>
</compile_context>

<pallas_src>
import jax
import jax.numpy as jnp
from jax.experimental import pallas as pl
from jax.experimental.pallas import tpu as pltpu

DIMS = [265, 200, 100, 100, 100, 100, 100, 100, 100]  # layer in/out chain
NUM_LAYERS = 8
EPS = 1e-3  # matches BatchNorm1d(eps=0.001) in the module

def _pad128(d):
    return ((d + 127) // 128) * 128

def _pad8(d):
    return ((d + 7) // 8) * 8

IN_PAD0 = _pad8(DIMS[0])                                   # 272 (sublane-aligned K for layer 0)
OUT_PADS = [_pad128(DIMS[i + 1]) for i in range(NUM_LAYERS)]  # [256, 128, 128, ...]
K_PADS = [IN_PAD0] + OUT_PADS[:-1]                         # K padding per layer
TB = 256                                                   # batch tile (rows)


def dense_classifier_kernel(x_ref, *refs):
    """Fused 8-layer MLP.  refs = 8 bf16 weights (Kp, Np), vec(10,256) f32, out."""
    w_refs = refs[:NUM_LAYERS]
    vec_ref = refs[NUM_LAYERS]
    o_ref = refs[NUM_LAYERS + 1]

    h = x_ref[...]  # f32 (TB, 272)
    for i in range(NUM_LAYERS):
        out_p = w_refs[i].shape[1]
        # Linear (MXU): bf16 x bf16 -> f32 accumulate.  Previous layer's BN is
        # already folded into this layer's weight/bias.
        z = jnp.dot(h.astype(jnp.bfloat16), w_refs[i][...],
                    preferred_element_type=jnp.float32)
        z = z + vec_ref[i:i + 1, :out_p]        # folded bias, f32
        h = jnp.maximum(z, 0.0)                 # ReLU, f32
        # Dropout: identity in eval mode
    # Last layer's BatchNorm (eval) applied explicitly after its ReLU.
    out_p = OUT_PADS[-1]
    h = h * vec_ref[8:9, :out_p] + vec_ref[9:10, :out_p]
    o_ref[...] = h


def init_params(key):
    """PyTorch-shaped params with non-trivial BN running statistics."""
    params = []
    for i in range(NUM_LAYERS):
        in_d, out_d = DIMS[i], DIMS[i + 1]
        key, kw, kb, kg, kbe, km, kv = jax.random.split(key, 7)
        bound = 1.0 / (in_d ** 0.5)
        w = jax.random.uniform(kw, (out_d, in_d), jnp.float32, -bound, bound)
        b = jax.random.uniform(kb, (out_d,), jnp.float32, -bound, bound)
        gamma = jax.random.uniform(kg, (out_d,), jnp.float32, 0.5, 1.5)
        beta = 0.1 * jax.random.normal(kbe, (out_d,), jnp.float32)
        rmean = 0.1 * jax.random.normal(km, (out_d,), jnp.float32)
        rvar = jax.random.uniform(kv, (out_d,), jnp.float32, 0.5, 1.5)
        params.append((w, b, gamma, beta, rmean, rvar))
    return params


def prepare_params(params):
    """One-time prep: BN fold into next layer, transpose, pad, cast weights to bf16."""
    ws = []
    vecs = jnp.zeros((10, 256), jnp.float32)
    prev_scale = None
    prev_shift = None
    for i, (w, b, gamma, beta, rmean, rvar) in enumerate(params):
        in_d, out_d = DIMS[i], DIMS[i + 1]
        if prev_scale is not None:
            # y_prev = s * relu_prev + t  =>  y_prev @ W.T + b = relu_prev @ (W*s).T + (b + W @ t)
            w_eff = w * prev_scale[None, :]
            b_eff = b + w @ prev_shift
        else:
            w_eff, b_eff = w, b
        in_p, out_p = K_PADS[i], OUT_PADS[i]
        wt = (jnp.zeros((in_p, out_p), jnp.float32)
              .at[:in_d, :out_d].set(w_eff.T)
              .astype(jnp.bfloat16))
        ws.append(wt)
        vecs = vecs.at[i, :out_d].set(b_eff)
        scale = gamma / jnp.sqrt(rvar + EPS)
        shift = beta - rmean * scale
        prev_scale, prev_shift = scale, shift
    # Last layer's BN stays explicit.
    vecs = vecs.at[8, :DIMS[-1]].set(prev_scale)
    vecs = vecs.at[9, :DIMS[-1]].set(prev_shift)
    return ws, vecs


def dense_classifier(x, ws, vecs):
    B, F = x.shape
    assert F == DIMS[0]
    B_pad = max(TB, ((B + TB - 1) // TB) * TB)
    x_p = jnp.zeros((B_pad, IN_PAD0), jnp.float32).at[:B, :F].set(x)

    grid = (B_pad // TB,)
    in_specs = [pl.BlockSpec((TB, IN_PAD0), lambda i: (i, 0))]
    for wp in ws:
        # Constant index map -> weights stay VMEM-resident across grid steps.
        in_specs.append(pl.BlockSpec(wp.shape, lambda i: (0, 0)))
    in_specs.append(pl.BlockSpec(vecs.shape, lambda i: (0, 0)))
    out_specs = pl.BlockSpec((TB, OUT_PADS[-1]), lambda i: (i, 0))

    out = pl.pallas_call(
        dense_classifier_kernel,
        out_shape=jax.ShapeDtypeStruct((B_pad, OUT_PADS[-1]), jnp.float32),
        grid=grid,
        in_specs=in_specs,
        out_specs=out_specs,
        compiler_params=pltpu.CompilerParams(dimension_semantics=("parallel",)),
    )(x_p, *ws, vecs)

    return out[:B, :DIMS[-1]]


def dense_classifier_ref(x, params):
    """Pure f32 reference with PyTorch semantics (Linear -> ReLU -> BN)."""
    h = x
    for (w, b, gamma, beta, rmean, rvar) in params:
        h = h @ w.T + b
        h = jnp.maximum(h, 0.0)
        h = (h - rmean) / jnp.sqrt(rvar + EPS) * gamma + beta
    return h


def dense_classifier_emul(x, ws, vecs):
    """Precision-matched emulation of the kernel math (validates folding/padding)."""
    B = x.shape[0]
    h = jnp.zeros((B, IN_PAD0), jnp.float32).at[:, :DIMS[0]].set(x)
    for i in range(NUM_LAYERS):
        out_p = OUT_PADS[i]
        z = jnp.dot(h.astype(jnp.bfloat16), ws[i], preferred_element_type=jnp.float32)
        z = z + vecs[i:i + 1, :out_p]
        h = jnp.maximum(z, 0.0)
    h = h * vecs[8:9, :OUT_PADS[-1]] + vecs[9:10, :OUT_PADS[-1]]
    return h[:, :DIMS[-1]]


if __name__ == "__main__":
    key = jax.random.PRNGKey(0)
    k_x, k_p = jax.random.split(key)
    x = jax.random.normal(k_x, (2, 265), jnp.float32)
    params = init_params(k_p)

    # One-time host-side parameter preparation (not on the per-call path).
    ws, vecs = prepare_params(params)
    ws = [jax.device_put(w) for w in ws]
    vecs = jax.device_put(vecs)

    fwd = jax.jit(dense_classifier)
    out = jax.block_until_ready(fwd(x, ws, vecs))
    assert out.shape == (2, 100), out.shape

    # Tight check vs a precision-matched (bf16-weight) emulation of the kernel.
    emul = dense_classifier_emul(x, ws, vecs)
    assert jnp.allclose(out, emul, atol=2e-3, rtol=2e-3), "mismatch vs bf16 emulation"

    # Loose check vs the full-f32 PyTorch-semantics reference (bf16 weight noise).
    ref = dense_classifier_ref(x, params)
    assert jnp.allclose(out, ref, atol=5e-2, rtol=5e-2), "mismatch vs f32 reference"

    print("KERNEL_OK")
</pallas_src>

<mosaic_0001>
module attributes {stable_mosaic.version = 11 : i64} {
  func.func @dense_classifier_kernel(%arg0: i32, %arg1: memref<256x272xf32, #tpu.memory_space<vmem>>, %arg2: memref<272x256xbf16, #tpu.memory_space<vmem>>, %arg3: memref<256x128xbf16, #tpu.memory_space<vmem>>, %arg4: memref<128x128xbf16, #tpu.memory_space<vmem>>, %arg5: memref<128x128xbf16, #tpu.memory_space<vmem>>, %arg6: memref<128x128xbf16, #tpu.memory_space<vmem>>, %arg7: memref<128x128xbf16, #tpu.memory_space<vmem>>, %arg8: memref<128x128xbf16, #tpu.memory_space<vmem>>, %arg9: memref<128x128xbf16, #tpu.memory_space<vmem>>, %arg10: memref<10x256xf32, #tpu.memory_space<vmem>>, %arg11: memref<256x128xf32, #tpu.memory_space<vmem>>) attributes {dimension_semantics = [#tpu.dimension_semantics<parallel>], iteration_bounds = array<i64: 1>, scalar_prefetch = 0 : i64, scratch_operands = 0 : i64, tpu.core_type = #tpu.core_type<tc>, window_params = [{transform_indices = @transform_0, window_bounds = array<i64: 256, 272>}, {pipeline_mode = #tpu.pipeline_mode<synchronous>, transform_indices = @transform_1, window_bounds = array<i64: 272, 256>}, {pipeline_mode = #tpu.pipeline_mode<synchronous>, transform_indices = @transform_2, window_bounds = array<i64: 256, 128>}, {pipeline_mode = #tpu.pipeline_mode<synchronous>, transform_indices = @transform_3, window_bounds = array<i64: 128, 128>}, {pipeline_mode = #tpu.pipeline_mode<synchronous>, transform_indices = @transform_4, window_bounds = array<i64: 128, 128>}, {pipeline_mode = #tpu.pipeline_mode<synchronous>, transform_indices = @transform_5, window_bounds = array<i64: 128, 128>}, {pipeline_mode = #tpu.pipeline_mode<synchronous>, transform_indices = @transform_6, window_bounds = array<i64: 128, 128>}, {pipeline_mode = #tpu.pipeline_mode<synchronous>, transform_indices = @transform_7, window_bounds = array<i64: 128, 128>}, {pipeline_mode = #tpu.pipeline_mode<synchronous>, transform_indices = @transform_8, window_bounds = array<i64: 128, 128>}, {pipeline_mode = #tpu.pipeline_mode<synchronous>, transform_indices = @transform_9, window_bounds = array<i64: 10, 256>}, {transform_indices = @transform_10, window_bounds = array<i64: 256, 128>}]} {
    %c0 = arith.constant 0 : index
    %c0_0 = arith.constant 0 : index
    %0 = vector.load %arg1[%c0, %c0_0] : memref<256x272xf32, #tpu.memory_space<vmem>>, vector<256x272xf32>
    %1 = arith.truncf %0 : vector<256x272xf32> to vector<256x272xbf16>
    %c0_1 = arith.constant 0 : index
    %c0_2 = arith.constant 0 : index
    %2 = vector.load %arg2[%c0_1, %c0_2] : memref<272x256xbf16, #tpu.memory_space<vmem>>, vector<272x256xbf16>
    %cst = arith.constant dense<0.000000e+00> : vector<256x256xf32>
    %3 = tpu.matmul %1, %2, %cst {dimension_numbers = #tpu.dot_dimension_numbers<[1], [0], [0], [1], [0, 0, 1, 1], [], []>} : vector<256x272xbf16>, vector<272x256xbf16>, vector<256x256xf32> -> vector<256x256xf32>
    %c0_3 = arith.constant 0 : index
    %c0_4 = arith.constant 0 : index
    %4 = vector.load %arg10[%c0_3, %c0_4] : memref<10x256xf32, #tpu.memory_space<vmem>>, vector<1x256xf32>
    %5 = vector.broadcast %4 : vector<1x256xf32> to vector<256x256xf32>
    %6 = arith.addf %3, %5 : vector<256x256xf32>
    %cst_5 = arith.constant 0.000000e+00 : f32
    %7 = vector.broadcast %cst_5 : f32 to vector<256x256xf32>
    %8 = arith.maximumf %6, %7 : vector<256x256xf32>
    %9 = arith.truncf %8 : vector<256x256xf32> to vector<256x256xbf16>
    %c0_6 = arith.constant 0 : index
    %c0_7 = arith.constant 0 : index
    %10 = vector.load %arg3[%c0_6, %c0_7] : memref<256x128xbf16, #tpu.memory_space<vmem>>, vector<256x128xbf16>
    %cst_8 = arith.constant dense<0.000000e+00> : vector<256x128xf32>
    %11 = tpu.matmul %9, %10, %cst_8 {dimension_numbers = #tpu.dot_dimension_numbers<[1], [0], [0], [1], [0, 0, 1, 1], [], []>} : vector<256x256xbf16>, vector<256x128xbf16>, vector<256x128xf32> -> vector<256x128xf32>
    %c1 = arith.constant 1 : index
    %c0_9 = arith.constant 0 : index
    %12 = vector.load %arg10[%c1, %c0_9] : memref<10x256xf32, #tpu.memory_space<vmem>>, vector<1x128xf32>
    %13 = vector.broadcast %12 : vector<1x128xf32> to vector<256x128xf32>
    %14 = arith.addf %11, %13 : vector<256x128xf32>
    %cst_10 = arith.constant 0.000000e+00 : f32
    %15 = vector.broadcast %cst_10 : f32 to vector<256x128xf32>
    %16 = arith.maximumf %14, %15 : vector<256x128xf32>
    %17 = arith.truncf %16 : vector<256x128xf32> to vector<256x128xbf16>
    %c0_11 = arith.constant 0 : index
    %c0_12 = arith.constant 0 : index
    %18 = vector.load %arg4[%c0_11, %c0_12] : memref<128x128xbf16, #tpu.memory_space<vmem>>, vector<128x128xbf16>
    %cst_13 = arith.constant dense<0.000000e+00> : vector<256x128xf32>
    %19 = tpu.matmul %17, %18, %cst_13 {dimension_numbers = #tpu.dot_dimension_numbers<[1], [0], [0], [1], [0, 0, 1, 1], [], []>} : vector<256x128xbf16>, vector<128x128xbf16>, vector<256x128xf32> -> vector<256x128xf32>
    %c2 = arith.constant 2 : index
    %c0_14 = arith.constant 0 : index
    %20 = vector.load %arg10[%c2, %c0_14] : memref<10x256xf32, #tpu.memory_space<vmem>>, vector<1x128xf32>
    %21 = vector.broadcast %20 : vector<1x128xf32> to vector<256x128xf32>
    %22 = arith.addf %19, %21 : vector<256x128xf32>
    %cst_15 = arith.constant 0.000000e+00 : f32
    %23 = vector.broadcast %cst_15 : f32 to vector<256x128xf32>
    %24 = arith.maximumf %22, %23 : vector<256x128xf32>
    %25 = arith.truncf %24 : vector<256x128xf32> to vector<256x128xbf16>
    %c0_16 = arith.constant 0 : index
    %c0_17 = arith.constant 0 : index
    %26 = vector.load %arg5[%c0_16, %c0_17] : memref<128x128xbf16, #tpu.memory_space<vmem>>, vector<128x128xbf16>
    %cst_18 = arith.constant dense<0.000000e+00> : vector<256x128xf32>
    %27 = tpu.matmul %25, %26, %cst_18 {dimension_numbers = #tpu.dot_dimension_numbers<[1], [0], [0], [1], [0, 0, 1, 1], [], []>} : vector<256x128xbf16>, vector<128x128xbf16>, vector<256x128xf32> -> vector<256x128xf32>
    %c3 = arith.constant 3 : index
    %c0_19 = arith.constant 0 : index
    %28 = vector.load %arg10[%c3, %c0_19] : memref<10x256xf32, #tpu.memory_space<vmem>>, vector<1x128xf32>
    %29 = vector.broadcast %28 : vector<1x128xf32> to vector<256x128xf32>
    %30 = arith.addf %27, %29 : vector<256x128xf32>
    %cst_20 = arith.constant 0.000000e+00 : f32
    %31 = vector.broadcast %cst_20 : f32 to vector<256x128xf32>
    %32 = arith.maximumf %30, %31 : vector<256x128xf32>
    %33 = arith.truncf %32 : vector<256x128xf32> to vector<256x128xbf16>
    %c0_21 = arith.constant 0 : index
    %c0_22 = arith.constant 0 : index
    %34 = vector.load %arg6[%c0_21, %c0_22] : memref<128x128xbf16, #tpu.memory_space<vmem>>, vector<128x128xbf16>
    %cst_23 = arith.constant dense<0.000000e+00> : vector<256x128xf32>
    %35 = tpu.matmul %33, %34, %cst_23 {dimension_numbers = #tpu.dot_dimension_numbers<[1], [0], [0], [1], [0, 0, 1, 1], [], []>} : vector<256x128xbf16>, vector<128x128xbf16>, vector<256x128xf32> -> vector<256x128xf32>
    %c4 = arith.constant 4 : index
    %c0_24 = arith.constant 0 : index
    %36 = vector.load %arg10[%c4, %c0_24] : memref<10x256xf32, #tpu.memory_space<vmem>>, vector<1x128xf32>
    %37 = vector.broadcast %36 : vector<1x128xf32> to vector<256x128xf32>
    %38 = arith.addf %35, %37 : vector<256x128xf32>
    %cst_25 = arith.constant 0.000000e+00 : f32
    %39 = vector.broadcast %cst_25 : f32 to vector<256x128xf32>
    %40 = arith.maximumf %38, %39 : vector<256x128xf32>
    %41 = arith.truncf %40 : vector<256x128xf32> to vector<256x128xbf16>
    %c0_26 = arith.constant 0 : index
    %c0_27 = arith.constant 0 : index
    %42 = vector.load %arg7[%c0_26, %c0_27] : memref<128x128xbf16, #tpu.memory_space<vmem>>, vector<128x128xbf16>
    %cst_28 = arith.constant dense<0.000000e+00> : vector<256x128xf32>
    %43 = tpu.matmul %41, %42, %cst_28 {dimension_numbers = #tpu.dot_dimension_numbers<[1], [0], [0], [1], [0, 0, 1, 1], [], []>} : vector<256x128xbf16>, vector<128x128xbf16>, vector<256x128xf32> -> vector<256x128xf32>
    %c5 = arith.constant 5 : index
    %c0_29 = arith.constant 0 : index
    %44 = vector.load %arg10[%c5, %c0_29] : memref<10x256xf32, #tpu.memory_space<vmem>>, vector<1x128xf32>
    %45 = vector.broadcast %44 : vector<1x128xf32> to vector<256x128xf32>
    %46 = arith.addf %43, %45 : vector<256x128xf32>
    %cst_30 = arith.constant 0.000000e+00 : f32
    %47 = vector.broadcast %cst_30 : f32 to vector<256x128xf32>
    %48 = arith.maximumf %46, %47 : vector<256x128xf32>
    %49 = arith.truncf %48 : vector<256x128xf32> to vector<256x128xbf16>
    %c0_31 = arith.constant 0 : index
    %c0_32 = arith.constant 0 : index
    %50 = vector.load %arg8[%c0_31, %c0_32] : memref<128x128xbf16, #tpu.memory_space<vmem>>, vector<128x128xbf16>
    %cst_33 = arith.constant dense<0.000000e+00> : vector<256x128xf32>
    %51 = tpu.matmul %49, %50, %cst_33 {dimension_numbers = #tpu.dot_dimension_numbers<[1], [0], [0], [1], [0, 0, 1, 1], [], []>} : vector<256x128xbf16>, vector<128x128xbf16>, vector<256x128xf32> -> vector<256x128xf32>
    %c6 = arith.constant 6 : index
    %c0_34 = arith.constant 0 : index
    %52 = vector.load %arg10[%c6, %c0_34] : memref<10x256xf32, #tpu.memory_space<vmem>>, vector<1x128xf32>
    %53 = vector.broadcast %52 : vector<1x128xf32> to vector<256x128xf32>
    %54 = arith.addf %51, %53 : vector<256x128xf32>
    %cst_35 = arith.constant 0.000000e+00 : f32
    %55 = vector.broadcast %cst_35 : f32 to vector<256x128xf32>
    %56 = arith.maximumf %54, %55 : vector<256x128xf32>
    %57 = arith.truncf %56 : vector<256x128xf32> to vector<256x128xbf16>
    %c0_36 = arith.constant 0 : index
    %c0_37 = arith.constant 0 : index
    %58 = vector.load %arg9[%c0_36, %c0_37] : memref<128x128xbf16, #tpu.memory_space<vmem>>, vector<128x128xbf16>
    %cst_38 = arith.constant dense<0.000000e+00> : vector<256x128xf32>
    %59 = tpu.matmul %57, %58, %cst_38 {dimension_numbers = #tpu.dot_dimension_numbers<[1], [0], [0], [1], [0, 0, 1, 1], [], []>} : vector<256x128xbf16>, vector<128x128xbf16>, vector<256x128xf32> -> vector<256x128xf32>
    %c7 = arith.constant 7 : index
    %c0_39 = arith.constant 0 : index
    %60 = vector.load %arg10[%c7, %c0_39] : memref<10x256xf32, #tpu.memory_space<vmem>>, vector<1x128xf32>
    %61 = vector.broadcast %60 : vector<1x128xf32> to vector<256x128xf32>
    %62 = arith.addf %59, %61 : vector<256x128xf32>
    %cst_40 = arith.constant 0.000000e+00 : f32
    %63 = vector.broadcast %cst_40 : f32 to vector<256x128xf32>
    %64 = arith.maximumf %62, %63 : vector<256x128xf32>
    %c8 = arith.constant 8 : index
    %c0_41 = arith.constant 0 : index
    %65 = vector.load %arg10[%c8, %c0_41] : memref<10x256xf32, #tpu.memory_space<vmem>>, vector<1x128xf32>
    %66 = vector.broadcast %65 : vector<1x128xf32> to vector<256x128xf32>
    %67 = arith.mulf %64, %66 : vector<256x128xf32>
    %c9 = arith.constant 9 : index
    %c0_42 = arith.constant 0 : index
    %68 = vector.load %arg10[%c9, %c0_42] : memref<10x256xf32, #tpu.memory_space<vmem>>, vector<1x128xf32>
    %69 = vector.broadcast %68 : vector<1x128xf32> to vector<256x128xf32>
    %70 = arith.addf %67, %69 : vector<256x128xf32>
    %c0_43 = arith.constant 0 : index
    %c0_44 = arith.constant 0 : index
    %71 = vector.load %arg11[%c0_43, %c0_44] : memref<256x128xf32, #tpu.memory_space<vmem>>, vector<256x128xf32>
    tpu.vector_store %arg11[%c0_43, %c0_44], %70 {strides = array<i32>} : memref<256x128xf32, #tpu.memory_space<vmem>>, vector<256x128xf32>,
    return
  }
  func.func @transform_0(%arg0: i32) -> (i32, i32) {
    %c0_i32 = arith.constant 0 : i32
    %c0_i32_0 = arith.constant 0 : i32
    return %arg0, %c0_i32 : i32, i32
  }
  func.func @transform_1(%arg0: i32) -> (i32, i32) {
    %c0_i32 = arith.constant 0 : i32
    %c0_i32_0 = arith.constant 0 : i32
    %c0_i32_1 = arith.constant 0 : i32
    return %c0_i32, %c0_i32_0 : i32, i32
  }
  func.func @transform_2(%arg0: i32) -> (i32, i32) {
    %c0_i32 = arith.constant 0 : i32
    %c0_i32_0 = arith.constant 0 : i32
    %c0_i32_1 = arith.constant 0 : i32
    return %c0_i32, %c0_i32_0 : i32, i32
  }
  func.func @transform_3(%arg0: i32) -> (i32, i32) {
    %c0_i32 = arith.constant 0 : i32
    %c0_i32_0 = arith.constant 0 : i32
    %c0_i32_1 = arith.constant 0 : i32
    return %c0_i32, %c0_i32_0 : i32, i32
  }
  func.func @transform_4(%arg0: i32) -> (i32, i32) {
    %c0_i32 = arith.constant 0 : i32
    %c0_i32_0 = arith.constant 0 : i32
    %c0_i32_1 = arith.constant 0 : i32
    return %c0_i32, %c0_i32_0 : i32, i32
  }
  func.func @transform_5(%arg0: i32) -> (i32, i32) {
    %c0_i32 = arith.constant 0 : i32
    %c0_i32_0 = arith.constant 0 : i32
    %c0_i32_1 = arith.constant 0 : i32
    return %c0_i32, %c0_i32_0 : i32, i32
  }
  func.func @transform_6(%arg0: i32) -> (i32, i32) {
    %c0_i32 = arith.constant 0 : i32
    %c0_i32_0 = arith.constant 0 : i32
    %c0_i32_1 = arith.constant 0 : i32
    return %c0_i32, %c0_i32_0 : i32, i32
  }
  func.func @transform_7(%arg0: i32) -> (i32, i32) {
    %c0_i32 = arith.constant 0 : i32
    %c0_i32_0 = arith.constant 0 : i32
    %c0_i32_1 = arith.constant 0 : i32
    return %c0_i32, %c0_i32_0 : i32, i32
  }
  func.func @transform_8(%arg0: i32) -> (i32, i32) {
    %c0_i32 = arith.constant 0 : i32
    %c0_i32_0 = arith.constant 0 : i32
    %c0_i32_1 = arith.constant 0 : i32
    return %c0_i32, %c0_i32_0 : i32, i32
  }
  func.func @transform_9(%arg0: i32) -> (i32, i32) {
    %c0_i32 = arith.constant 0 : i32
    %c0_i32_0 = arith.constant 0 : i32
    %c0_i32_1 = arith.constant 0 : i32
    return %c0_i32, %c0_i32_0 : i32, i32
  }
  func.func @transform_10(%arg0: i32) -> (i32, i32) {
    %c0_i32 = arith.constant 0 : i32
    %c0_i32_0 = arith.constant 0 : i32
    return %arg0, %c0_i32 : i32, i32
  }
}

</mosaic_0001>

<bundles_post_ra>
// kernel: dense_classifier.1
= control target key start
LH: loop header
LB: loop body
LE: loop exit
PB: predicated region body
PF: predicated region fallthrough
CT: control target
= control target key end

     0   :  { %15 = vsyncpa [#allocation3], 0  ;;  %s3955_s13 = smov [#allocation2]   ;;  %s5110_s0 = inlined_call_operand.vmem [shape: f32[256,272], index: 0, kind: input, shape index: {}]   ;;  %s5111_s1 = inlined_call_operand.vmem [shape: bf16[272,256], index: 1, kind: input, shape index: {}]   ;;  %s5112_s2 = inlined_call_operand.vmem [shape: bf16[256,128], index: 2, kind: input, shape index: {}]   ;;  %s5113_s3 = inlined_call_operand.vmem [shape: bf16[128,128], index: 3, kind: input, shape index: {}]   ;;  %s5114_s4 = inlined_call_operand.vmem [shape: bf16[128,128], index: 4, kind: input, shape index: {}]   ;;  %s5115_s5 = inlined_call_operand.vmem [shape: bf16[128,128], index: 5, kind: input, shape index: {}]   ;;  %s5116_s6 = inlined_call_operand.vmem [shape: bf16[128,128], index: 6, kind: input, shape index: {}]   ;;  %s5117_s7 = inlined_call_operand.vmem [shape: bf16[128,128], index: 7, kind: input, shape index: {}]   ;;  %s5118_s8 = inlined_call_operand.vmem [shape: bf16[128,128], index: 8, kind: input, shape index: {}]   ;;  %s5119_s9 = inlined_call_operand.hbm [shape: f32[10,256], index: 9, kind: input, shape index: {}]   ;;  %s5120_s10 = inlined_call_operand.vmem [shape: f32[256,128], index: 10, kind: output, shape index: {}]  }
   0x1   :  { %s39_s14 = sshll.u32 %s3955_s13, 4  ;;  %s3931_s17 = scalar_lea.hbm %s5119_s9, 512  ;;  %s40_s14 = int_to_ptr.vmem [resolvable:$true] %s39_s14 }
   0x2   :  { %p3932_p0 = scmp.ne.s32.totalorder %s5119_s9, %s3931_s17  ;;  %p3935_p1 = scmp.lt.u32.totalorder %s3931_s17, %s5119_s9 }
   0x4   :  { %p3937_p2 = pnand %p3935_p1, %p3932_p0 }
   0x6   :  { %3940 = shalt.err (!%p3937_p2)
}
   0x7   :  { %s3941_s22 = scalar_lea.vmem %s40_s14, 512  ;;  %p3946_p4 = scmp.lt.s32.totalorder %s40_s14, %s40_s14 }
   0x8   :  { %p3942_p3 = scmp.ne.s32.totalorder %s40_s14, %s3941_s22  ;;  %p3947_p5 = scmp.lt.s32.totalorder %s3941_s22, %s3941_s22 }
   0xa   :  { %p3948_p6 = por %p3947_p5, %p3946_p4 }
   0xc   :  { %p3949_p7 = pnand %p3948_p6, %p3942_p3 }
   0xe   :  { %3952 = shalt.err (!%p3949_p7)
}
   0xf   :  { %s3956_s23 = smov 256   ;;  %s3957_s24 = smov 16  }
  0x10   :  { %45 = dma.hbm_to_vmem [thread:$0]  %s5119_s9, 512, %s40_s14, [#allocation3], %s3956_s23, %s3956_s23, %s3957_s24  }
  0x11   :  { %3953 = dma.done.wait [#allocation3], 512  }
  0x12   :  { %3954 = vsyncadd [#allocation3], 4294966784  ;;  %v3816_v0 = vld [vmem:[%s5111_s1 + $0x4] ss:$8 sps:$4 sm:$0xff]   ;;  %v3818_v1 = vld [vmem:[%s5111_s1] ss:$8 sps:$4 sm:$0xff]  }
  0x13   :  { %459 = vmatprep.subr.bf16.mxu0 %v3816_v0  ;;  %v3819_v2 = vld [vmem:[%s5111_s1 + $0x14] ss:$8 sps:$4 sm:$0xff]   ;;  %v3821_v3 = vld [vmem:[%s5111_s1 + $0x10] ss:$8 sps:$4 sm:$0xff]   ;;  %v3822_v4 = vld [vmem:[%s5111_s1 + $0x24] ss:$8 sps:$4 sm:$0xff]  }
  0x14   :  { %460 = vmatpush1.bf16.msra.mxu0 %v3818_v1  ;;  %v3824_v5 = vld [vmem:[%s5111_s1 + $0x20] ss:$8 sps:$4 sm:$0xff]   ;;  %v3825_v6 = vld [vmem:[%s5111_s1 + $0x34] ss:$8 sps:$4 sm:$0xff]   ;;  %v3827_v7 = vld [vmem:[%s5111_s1 + $0x30] ss:$8 sps:$4 sm:$0xff]  }
  0x15   :  { %461 = vmatprep.subr.bf16.mxu0 %v3819_v2  ;;  %v3828_v8 = vld [vmem:[%s5111_s1 + $0x44] ss:$8 sps:$4 sm:$0xff]   ;;  %v3830_v9 = vld [vmem:[%s5111_s1 + $0x40] ss:$8 sps:$4 sm:$0xff]   ;;  %v3831_v10 = vld [vmem:[%s5111_s1 + $0x54] ss:$8 sps:$4 sm:$0xff]  }
  0x16   :  { %v3833_v11 = vld [vmem:[%s5111_s1 + $0x50] ss:$8 sps:$4 sm:$0xff]   ;;  %v3834_v12 = vld [vmem:[%s5111_s1 + $0x64] ss:$8 sps:$4 sm:$0xff]   ;;  %v3836_v16 = vld [vmem:[%s5111_s1 + $0x60] ss:$8 sps:$4 sm:$0xff]  }
  0x17   :  { %v51_v13 = vld [vmem:[%s5110_s0 + $0x8] sm:$0xff]  ;;  %v54_v14 = vld [vmem:[%s5110_s0 + $0x20] sm:$0xff]  ;;  %v3837_v17 = vld [vmem:[%s5111_s1 + $0x74] ss:$8 sps:$4 sm:$0xff]   ;;  %vm410_vm0 = vcmask 130048  }
  0x18   :  { %462 = vmatpush1.bf16.msra.mxu0 %v3821_v3  ;;  %v147_v15 = vpack.c.bf16 %v54_v14, %v51_v13  ;;  %v3839_v18 = vld [vmem:[%s5111_s1 + $0x70] ss:$8 sps:$4 sm:$0xff]   ;;  %v3840_v19 = vld [vmem:[%s5111_s1 + $0x84] ss:$8 sps:$4 sm:$0xff]   ;;  %v3842_v20 = vld [vmem:[%s5111_s1 + $0x80] ss:$8 sps:$4 sm:$0xff]  }
  0x19   :  { %463 = vmatprep.subr.bf16.mxu0 %v3822_v4  ;;  %v3843_v21 = vld [vmem:[%s5111_s1 + $0x94] ss:$8 sps:$4 sm:$0xff]   ;;  %v3845_v22 = vld [vmem:[%s5111_s1 + $0x90] ss:$8 sps:$4 sm:$0xff]   ;;  %v3846_v23 = vld [vmem:[%s5111_s1 + $0xa4] ss:$8 sps:$4 sm:$0xff]  }
  0x1a   :  { %491 = vmatprep.mubr.bf16.mxu0 %v147_v15  ;;  %v3848_v24 = vld [vmem:[%s5111_s1 + $0xa0] ss:$8 sps:$4 sm:$0xff]   ;;  %v3849_v25 = vld [vmem:[%s5111_s1 + $0xb4] ss:$8 sps:$4 sm:$0xff]   ;;  %v3851_v26 = vld [vmem:[%s5111_s1 + $0xb0] ss:$8 sps:$4 sm:$0xff]  }
  0x1b   :  { %v3852_v27 = vld [vmem:[%s5111_s1 + $0xc4] ss:$8 sps:$4 sm:$0xff]   ;;  %v3854_v28 = vld [vmem:[%s5111_s1 + $0xc0] ss:$8 sps:$4 sm:$0xff]   ;;  %v3855_v29 = vld [vmem:[%s5111_s1 + $0xd4] ss:$8 sps:$4 sm:$0xff]  }
  0x1c   :  { %464 = vmatpush1.bf16.msra.mxu0 %v3824_v5  ;;  %v3857_v30 = vld [vmem:[%s5111_s1 + $0xd0] ss:$8 sps:$4 sm:$0xff]   ;;  %v3858_v31 = vld [vmem:[%s5111_s1 + $0xe4] ss:$8 sps:$4 sm:$0xff]   ;;  %v3860_v32 = vld [vmem:[%s5111_s1 + $0xe0] ss:$8 sps:$4 sm:$0xff]  }
  0x1d   :  { %465 = vmatprep.subr.bf16.mxu0 %v3825_v6  ;;  %v3861_v33 = vld [vmem:[%s5111_s1 + $0xf4] ss:$8 sps:$4 sm:$0xff]   ;;  %v3863_v34 = vld [vmem:[%s5111_s1 + $0xf0] ss:$8 sps:$4 sm:$0xff]   ;;  %v50_v35 = vld [vmem:[%s5110_s0] sm:$0xff] }
  0x1e   :  { %v53_v36 = vld [vmem:[%s5110_s0 + $0x18] sm:$0xff]  ;;  %v3866_v37 = vld [vmem:[%s5111_s1 + $0x104] ss:$8 sps:$4 sm:$0xff]   ;;  %v60_v39 = vld [vmem:[%s5110_s0 + $0x50] sm:$0xff] }
  0x1f   :  { %v57_v38 = vld [vmem:[%s5110_s0 + $0x38] sm:$0xff]  ;;  %v3864_v40 = vld [vmem:[%s5111_s1 + $0x100] ss:$8 sps:$4 sm:$0xff]   ;;  %v146_v41 = vpack.c.bf16 %v53_v36, %v50_v35  ;;  %v56_v43 = vld [vmem:[%s5110_s0 + $0x30] sm:$0xff] }
  0x20   :  { %466 = vmatpush1.bf16.msra.mxu0 %v3827_v7  ;;  %v150_v42 = vpack.c.bf16 %v60_v39, %v57_v38  ;;  %v59_v44 = vld [vmem:[%s5110_s0 + $0x48] sm:$0xff]  ;;  %v66_v46 = vld [vmem:[%s5110_s0 + $0x80] sm:$0xff]  ;;  %v65_v50 = vld [vmem:[%s5110_s0 + $0x78] sm:$0xff] }
  0x21   :  { %467 = vmatprep.subr.bf16.mxu0 %v3828_v8  ;;  %v63_v45 = vld [vmem:[%s5110_s0 + $0x68] sm:$0xff]  ;;  %v149_v47 = vpack.c.bf16 %v59_v44, %v56_v43  ;;  %v62_v49 = vld [vmem:[%s5110_s0 + $0x60] sm:$0xff]  ;;  %v69_v51 = vld [vmem:[%s5110_s0 + $0x98] sm:$0xff] }
  0x22   :  { %v153_v48 = vpack.c.bf16 %v66_v46, %v63_v45  ;;  %v72_v52 = vld [vmem:[%s5110_s0 + $0xb0] sm:$0xff]  ;;  %v152_v53 = vpack.c.bf16 %v65_v50, %v62_v49  ;;  %v71_v56 = vld [vmem:[%s5110_s0 + $0xa8] sm:$0xff]  ;;  %v78_v58 = vld [vmem:[%s5110_s0 + $0xe0] sm:$0xff] }
  0x23   :  { %v156_v54 = vpack.c.bf16 %v72_v52, %v69_v51  ;;  %v68_v55 = vld [vmem:[%s5110_s0 + $0x90] sm:$0xff]  ;;  %v75_v57 = vld [vmem:[%s5110_s0 + $0xc8] sm:$0xff]  ;;  %v74_v61 = vld [vmem:[%s5110_s0 + $0xc0] sm:$0xff] }
  0x24   :  { %468 = vmatpush1.bf16.msra.mxu0 %v3830_v9  ;;  %v155_v59 = vpack.c.bf16 %v71_v56, %v68_v55  ;;  %v159_v60 = vpack.c.bf16 %v78_v58, %v75_v57  ;;  %v77_v62 = vld [vmem:[%s5110_s0 + $0xd8] sm:$0xff]  ;;  %v84_v0 = vld [vmem:[%s5110_s0 + $0x110] sm:$0xff]  ;;  %v83_v4 = vld [vmem:[%s5110_s0 + $0x108] sm:$0xff] }
  0x25   :  { %469 = vmatprep.subr.bf16.mxu0 %v3831_v10  ;;  %v81_v63 = vld [vmem:[%s5110_s0 + $0xf8] sm:$0xff]  ;;  %v158_v1 = vpack.c.bf16 %v77_v62, %v74_v61  ;;  %v80_v3 = vld [vmem:[%s5110_s0 + $0xf0] sm:$0xff]  ;;  %v87_v5 = vld [vmem:[%s5110_s0 + $0x128] sm:$0xff] }
  0x26   :  { %v162_v2 = vpack.c.bf16 %v84_v0, %v81_v63  ;;  %v90_v6 = vld [vmem:[%s5110_s0 + $0x140] sm:$0xff]  ;;  %v161_v7 = vpack.c.bf16 %v83_v4, %v80_v3  ;;  %v89_v10 = vld [vmem:[%s5110_s0 + $0x138] sm:$0xff]  ;;  %v92_v15 = vld [vmem:[%s5110_s0 + $0x150] sm:$0xff] }
  0x27   :  { %v165_v8 = vpack.c.bf16 %v90_v6, %v87_v5  ;;  %v86_v9 = vld [vmem:[%s5110_s0 + $0x120] sm:$0xff]  ;;  %v117_v35 = vld [vmem:[%s5110_s0 + $0x218] sm:$0xff]  ;;  %v120_v36 = vld [vmem:[%s5110_s0 + $0x230] sm:$0xff]  ;;  %v3958_v5 = vmov 0  }
  0x28   :  { %470 = vmatpush1.bf16.msra.mxu0 %v3833_v11  ;;  %v93_v11 = vld [vmem:[%s5110_s0 + $0x158] sm:$0xff]  ;;  %v164_v13 = vpack.c.bf16 %v89_v10, %v86_v9  ;;  %v180_v38 = vpack.c.bf16 %v120_v36, %v117_v35  ;;  %v116_v39 = vld [vmem:[%s5110_s0 + $0x210] sm:$0xff]  ;;  %v122_v45 = vld [vmem:[%s5110_s0 + $0x240] sm:$0xff] }
  0x29   :  { %471 = vmatprep.subr.bf16.mxu0 %v3834_v12  ;;  %v96_v12 = vld [vmem:[%s5110_s0 + $0x170] sm:$0xff]  ;;  %v125_v46 = vld [vmem:[%s5110_s0 + $0x258] sm:$0xff]  ;;  %v131_v52 = vld [vmem:[%s5110_s0 + $0x288] sm:$0xff] }
  0x2a   :  { %v168_v14 = vpack.c.bf16 %v96_v12, %v93_v11  ;;  %v182_v49 = vpack.c.bf16 %v125_v46, %v122_v45  ;;  %v128_v51 = vld [vmem:[%s5110_s0 + $0x270] sm:$0xff]  ;;  %v134_v57 = vld [vmem:[%s5110_s0 + $0x2a0] sm:$0xff]  ;;  %v137_v58 = vld [vmem:[%s5110_s0 + $0x2b8] sm:$0xff] }
  0x2b   :  { %v185_v55 = vpack.c.bf16 %v131_v52, %v128_v51  ;;  %v188_v61 = vpack.c.bf16 %v137_v58, %v134_v57  ;;  %v140_v63 = vld [vmem:[%s5110_s0 + $0x2d0] sm:$0xff]  ;;  %v143_v0 = vld [vmem:[%s5110_s0 + $0x2e8] sm:$0xff]  ;;  %v3868_v3 = vld [vmem:[%s5112_s2] sm:$0xff]  }
  0x2c   :  { %472 = vmatpush1.bf16.msra.mxu0 %v3836_v16  ;;  %v95_v16 = vld [vmem:[%s5110_s0 + $0x168] sm:$0xff]  ;;  %v52_v6 = vld [vmem:[%s5110_s0 + $0x10] sm:$0xff]  ;;  %v3873_v12 = vld [vmem:[%s5112_s2 + $0x58] sm:$0xff]  }
  0x2d   :  { %473 = vmatprep.subr.bf16.mxu0 %v3837_v17  ;;  %v99_v17 = vld [vmem:[%s5110_s0 + $0x188] sm:$0xff]  ;;  %v3871_v10 = vld [vmem:[%s5112_s2 + $0x50] sm:$0xff]   ;;  %v94_v35 = vld [vmem:[%s5110_s0 + $0x160] sm:$0xff] }
  0x2e   :  { %v3869_v4 = vld [vmem:[%s5112_s2 + $0x48] sm:$0xff]   ;;  %v3872_v11 = vld [vmem:[%s5112_s2 + $0x10] sm:$0xff]   ;;  %v97_v36 = vld [vmem:[%s5110_s0 + $0x178] sm:$0xff] }
  0x2f   :  { %v115_v45 = vld [vmem:[%s5110_s0 + $0x208] sm:$0xff]  ;;  %v3879_v51 = vld [vmem:[%s5112_s2 + $0x70] sm:$0xff]   ;;  %v130_v58 = vld [vmem:[%s5110_s0 + $0x280] sm:$0xff] }
  0x30   :  { %474 = vmatpush1.bf16.msra.mxu0 %v3839_v18  ;;  %v102_v18 = vld [vmem:[%s5110_s0 + $0x1a0] sm:$0xff]  ;;  %v3880_v52 = vld [vmem:[%s5112_s2 + $0x30] sm:$0xff]  }
  0x31   :  { %475 = vmatprep.subr.bf16.mxu0 %v3840_v19  ;;  %v167_v19 = vpack.c.bf16 %v95_v16, %v92_v15  ;;  %v3874_v15 = vld [vmem:[%s5112_s2 + $0x18] sm:$0xff]  }
  0x34   :  { %476 = vmatpush1.bf16.msra.mxu0 %v3842_v20  ;;  %v171_v20 = vpack.c.bf16 %v102_v18, %v99_v17  ;;  %v3875_v17 = vld [vmem:[%s5112_s2 + $0x60] sm:$0xff]  }
  0x35   :  { %477 = vmatprep.subr.bf16.mxu0 %v3843_v21  ;;  %v98_v21 = vld [vmem:[%s5110_s0 + $0x180] sm:$0xff] }
  0x36   :  { %v3876_v18 = vld [vmem:[%s5112_s2 + $0x20] sm:$0xff]  }
  0x38   :  { %478 = vmatpush1.bf16.msra.mxu0 %v3845_v22  ;;  %v101_v22 = vld [vmem:[%s5110_s0 + $0x198] sm:$0xff] }
  0x39   :  { %479 = vmatprep.subr.bf16.mxu0 %v3846_v23  ;;  %v105_v23 = vld [vmem:[%s5110_s0 + $0x1b8] sm:$0xff] }
  0x3c   :  { %480 = vmatpush1.bf16.msra.mxu0 %v3848_v24  ;;  %v108_v24 = vld [vmem:[%s5110_s0 + $0x1d0] sm:$0xff] }
  0x3d   :  { %481 = vmatprep.subr.bf16.mxu0 %v3849_v25  ;;  %v170_v25 = vpack.c.bf16 %v101_v22, %v98_v21  ;;  %v67_v21 = vld [vmem:[%s5110_s0 + $0x88] sm:$0xff] }
  0x40   :  { %482 = vmatpush1.bf16.msra.mxu0 %v3851_v26  ;;  %v174_v26 = vpack.c.bf16 %v108_v24, %v105_v23  ;;  %v70_v23 = vld [vmem:[%s5110_s0 + $0xa0] sm:$0xff]  ;;  %v73_v24 = vld [vmem:[%s5110_s0 + $0xb8] sm:$0xff] }
  0x41   :  { %483 = vmatprep.subr.bf16.mxu0 %v3852_v27  ;;  %v104_v27 = vld [vmem:[%s5110_s0 + $0x1b0] sm:$0xff] }
  0x44   :  { %484 = vmatpush1.bf16.msra.mxu0 %v3854_v28  ;;  %v107_v28 = vld [vmem:[%s5110_s0 + $0x1c8] sm:$0xff] }
  0x45   :  { %485 = vmatprep.subr.bf16.mxu0 %v3855_v29  ;;  %v111_v29 = vld [vmem:[%s5110_s0 + $0x1e8] sm:$0xff] }
  0x48   :  { %486 = vmatpush1.bf16.msra.mxu0 %v3857_v30  ;;  %v114_v30 = vld [vmem:[%s5110_s0 + $0x200] sm:$0xff] }
  0x49   :  { %487 = vmatprep.subr.bf16.mxu0 %v3858_v31  ;;  %v173_v31 = vpack.c.bf16 %v107_v28, %v104_v27  ;;  %v79_v27 = vld [vmem:[%s5110_s0 + $0xe8] sm:$0xff] }
  0x4c   :  { %488 = vmatpush1.bf16.msra.mxu0 %v3860_v32  ;;  %v177_v32 = vpack.c.bf16 %v114_v30, %v111_v29  ;;  %v82_v29 = vld [vmem:[%s5110_s0 + $0x100] sm:$0xff]  ;;  %v85_v30 = vld [vmem:[%s5110_s0 + $0x118] sm:$0xff] }
  0x4d   :  { %489 = vmatprep.subr.bf16.mxu0 %v3861_v33  ;;  %v110_v33 = vld [vmem:[%s5110_s0 + $0x1e0] sm:$0xff] }
  0x50   :  { %490 = vmatpush1.bf16.msra.mxu0 %v3863_v34  ;;  %v113_v34 = vld [vmem:[%s5110_s0 + $0x1f8] sm:$0xff] }
  0x51   :  { %652 = vmatprep.subr.bf16.mxu0 %v3866_v37  ;;  %v176_v37 = vpack.c.bf16 %v113_v34, %v110_v33  ;;  %v91_v33 = vld [vmem:[%s5110_s0 + $0x148] sm:$0xff] }
  0x53   :  { %492 = vmatmul.mubr.bf16.vlgmr.msra.gmra.mrb[0].mxu0 %v146_v41  ;;  %v123_v41 = vld [vmem:[%s5110_s0 + $0x248] sm:$0xff] }
  0x54   :  { %653 = vmatpush1.bf16.msra.mxu0 %v3864_v40  ;;  %501 = vmatprep.mubr.bf16.mxu0 %v150_v42  ;;  %v119_v40 = vld [vmem:[%s5110_s0 + $0x228] sm:$0xff]  ;;  %v126_v42 = vld [vmem:[%s5110_s0 + $0x260] sm:$0xff] }
  0x55   :  { %v179_v43 = vpack.c.bf16 %v119_v40, %v116_v39  ;;  %v183_v44 = vpack.c.bf16 %v126_v42, %v123_v41  ;;  %v103_v39 = vld [vmem:[%s5110_s0 + $0x1a8] sm:$0xff]  ;;  %v106_v41 = vld [vmem:[%s5110_s0 + $0x1c0] sm:$0xff]  ;;  %v109_v42 = vld [vmem:[%s5110_s0 + $0x1d8] sm:$0xff] }
  0x5b   :  { %502 = vmatmul.mubr.bf16.gmra.mrb[4].mxu0 %v149_v47  ;;  %v129_v47 = vld [vmem:[%s5110_s0 + $0x278] sm:$0xff] }
  0x5c   :  { %511 = vmatprep.mubr.bf16.mxu0 %v153_v48  ;;  %v132_v48 = vld [vmem:[%s5110_s0 + $0x290] sm:$0xff] }
  0x5d   :  { %v186_v50 = vpack.c.bf16 %v132_v48, %v129_v47  ;;  %v118_v47 = vld [vmem:[%s5110_s0 + $0x220] sm:$0xff]  ;;  %v121_v48 = vld [vmem:[%s5110_s0 + $0x238] sm:$0xff] }
  0x63   :  { %512 = vmatmul.mubr.bf16.gmra.mrb[8].mxu0 %v152_v53  ;;  %v135_v53 = vld [vmem:[%s5110_s0 + $0x2a8] sm:$0xff] }
  0x64   :  { %521 = vmatprep.mubr.bf16.mxu0 %v156_v54  ;;  %v138_v54 = vld [vmem:[%s5110_s0 + $0x2c0] sm:$0xff] }
  0x65   :  { %v189_v56 = vpack.c.bf16 %v138_v54, %v135_v53  ;;  %v3881_v53 = vld [vmem:[%s5112_s2 + $0x78] sm:$0xff]   ;;  %v124_v54 = vld [vmem:[%s5110_s0 + $0x250] sm:$0xff] }
  0x6b   :  { %522 = vmatmul.mubr.bf16.gmra.mrb[12].mxu0 %v155_v59  ;;  %v141_v59 = vld [vmem:[%s5110_s0 + $0x2d8] sm:$0xff] }
  0x6c   :  { %531 = vmatprep.mubr.bf16.mxu0 %v159_v60  ;;  %v144_v60 = vld [vmem:[%s5110_s0 + $0x2f0] sm:$0xff] }
  0x6d   :  { %v192_v62 = vpack.c.bf16 %v144_v60, %v141_v59  ;;  %v133_v59 = vld [vmem:[%s5110_s0 + $0x298] sm:$0xff] }
  0x6e   :  { %v187_v60 = vpack.c.bf16 %v133_v59, %v130_v58 }
  0x73   :  { %532 = vmatmul.mubr.bf16.gmra.mrb[16].mxu0 %v158_v1  ;;  %v191_v1 = vpack.c.bf16 %v143_v0, %v140_v63  ;;  %v142_v0 = vld [vmem:[%s5110_s0 + $0x2e0] sm:$0xff] }
  0x74   :  { %541 = vmatprep.mubr.bf16.mxu0 %v162_v2  ;;  %v3867_v2 = vld [vmem:[%s5112_s2 + $0x40] sm:$0xff]  }
  0x75   :  { %3124 = vmatprep.subr.bf16.mxu1 %v3867_v2 }
  0x76   :  { %3125 = vmatpush3.bf16.msra.mxu1 %v3868_v3  ;;  %v230_v3 = vlaneseq }
  0x77   :  { %3126 = vmatprep.subr.bf16.mxu1 %v3869_v4 }
  0x78   :  { %v231_v4 = vshrl.u32 %v230_v3, 7 }
  0x7b   :  { %542 = vmatmul.mubr.bf16.gmra.mrb[20].mxu0 %v161_v7  ;;  %v55_v7 = vld [vmem:[%s5110_s0 + $0x28] sm:$0xff] }
  0x7c   :  { %551 = vmatprep.mubr.bf16.mxu0 %v165_v8  ;;  %v3870_v8 = vld [vmem:[%s5112_s2 + $0x8] sm:$0xff]   ;;  %v148_v9 = vpack.c.bf16 %v55_v7, %v52_v6  ;;  %v232_v6 = vsub.s32 0, %v231_v4 }
  0x7d   :  { %3127 = vmatpush3.bf16.msra.mxu1 %v3870_v8  ;;  %v228_v7 = vld [vmem:[#allocation2] ss:$8 sm:$0x3]  ;;  %v236_v8 = vsub.s32 1, %v231_v4 }
  0x7e   :  { %3128 = vmatprep.subr.bf16.mxu1 %v3871_v10 }
  0x7f   :  { %v4498_v10 = vrot.slane %v228_v7, %v236_v8 }
  0x81   :  { %3129 = vmatpush3.bf16.msra.mxu1 %v3872_v11 }
  0x82   :  { %3130 = vmatprep.subr.bf16.mxu1 %v3873_v12 }
  0x83   :  { %552 = vmatmul.mubr.bf16.gmra.mrb[24].mxu0 %v164_v13  ;;  %v58_v13 = vld [vmem:[%s5110_s0 + $0x40] sm:$0xff] }
  0x84   :  { %561 = vmatprep.mubr.bf16.mxu0 %v168_v14  ;;  %v61_v14 = vld [vmem:[%s5110_s0 + $0x58] sm:$0xff] }
  0x85   :  { %v151_v16 = vpack.c.bf16 %v61_v14, %v58_v13  ;;  %3131 = vmatpush3.bf16.msra.mxu1 %v3874_v15 }
  0x86   :  { %3132 = vmatprep.subr.bf16.mxu1 %v3875_v17  ;;  %v3883_v17 = vld [vmem:[%s5113_s3] sm:$0xff]  }
  0x89   :  { %3133 = vmatpush3.bf16.msra.mxu1 %v3876_v18 }
  0x8b   :  { %562 = vmatmul.mubr.bf16.gmra.mrb[28].mxu0 %v167_v19  ;;  %v3877_v19 = vld [vmem:[%s5112_s2 + $0x68] sm:$0xff]  }
  0x8c   :  { %571 = vmatprep.mubr.bf16.mxu0 %v171_v20  ;;  %v64_v20 = vld [vmem:[%s5110_s0 + $0x70] sm:$0xff]  ;;  %3134 = vmatprep.subr.bf16.mxu1 %v3877_v19 }
  0x8d   :  { %v154_v22 = vpack.c.bf16 %v67_v21, %v64_v20 }
  0x93   :  { %572 = vmatmul.mubr.bf16.gmra.mrb[32].mxu0 %v170_v25  ;;  %v157_v25 = vpack.c.bf16 %v73_v24, %v70_v23 }
  0x94   :  { %581 = vmatprep.mubr.bf16.mxu0 %v174_v26  ;;  %v76_v26 = vld [vmem:[%s5110_s0 + $0xd0] sm:$0xff] }
  0x95   :  { %v160_v28 = vpack.c.bf16 %v79_v27, %v76_v26 }
  0x9b   :  { %582 = vmatmul.mubr.bf16.gmra.mrb[36].mxu0 %v173_v31  ;;  %v163_v31 = vpack.c.bf16 %v85_v30, %v82_v29 }
  0x9c   :  { %591 = vmatprep.mubr.bf16.mxu0 %v177_v32  ;;  %v88_v32 = vld [vmem:[%s5110_s0 + $0x130] sm:$0xff] }
  0x9d   :  { %v166_v34 = vpack.c.bf16 %v91_v33, %v88_v32 }
  0xa3   :  { %592 = vmatmul.mubr.bf16.gmra.mrb[40].mxu0 %v176_v37  ;;  %v169_v37 = vpack.c.bf16 %v97_v36, %v94_v35  ;;  %v3885_v36 = vld [vmem:[%s5113_s3 + $0x10] sm:$0xff]  }
  0xa4   :  { %601 = vmatprep.mubr.bf16.mxu0 %v180_v38  ;;  %v100_v38 = vld [vmem:[%s5110_s0 + $0x190] sm:$0xff] }
  0xa5   :  { %v172_v40 = vpack.c.bf16 %v103_v39, %v100_v38 }
  0xab   :  { %602 = vmatmul.mubr.bf16.gmra.mrb[44].mxu0 %v179_v43  ;;  %v175_v43 = vpack.c.bf16 %v109_v42, %v106_v41 }
  0xac   :  { %611 = vmatprep.mubr.bf16.mxu0 %v183_v44  ;;  %v112_v44 = vld [vmem:[%s5110_s0 + $0x1f0] sm:$0xff] }
  0xad   :  { %v178_v46 = vpack.c.bf16 %v115_v45, %v112_v44  ;;  %v3886_v44 = vld [vmem:[%s5113_s3 + $0x18] sm:$0xff]  }
  0xb3   :  { %612 = vmatmul.mubr.bf16.gmra.mrb[48].mxu0 %v182_v49  ;;  %v3878_v49 = vld [vmem:[%s5112_s2 + $0x28] sm:$0xff]  }
  0xb4   :  { %621 = vmatprep.mubr.bf16.mxu0 %v186_v50  ;;  %3135 = vmatpush3.bf16.msra.mxu1 %v3878_v49  ;;  %v181_v50 = vpack.c.bf16 %v121_v48, %v118_v47 }
  0xb5   :  { %3136 = vmatprep.subr.bf16.mxu1 %v3879_v51 }
  0xb8   :  { %3137 = vmatpush3.bf16.msra.mxu1 %v3880_v52 }
  0xb9   :  { %3138 = vmatprep.subr.bf16.mxu1 %v3881_v53 }
  0xbb   :  { %622 = vmatmul.mubr.bf16.gmra.mrb[52].mxu0 %v185_v55  ;;  %v127_v55 = vld [vmem:[%s5110_s0 + $0x268] sm:$0xff] }
  0xbc   :  { %631 = vmatprep.mubr.bf16.mxu0 %v189_v56  ;;  %v3882_v56 = vld [vmem:[%s5112_s2 + $0x38] sm:$0xff]   ;;  %v184_v57 = vpack.c.bf16 %v127_v55, %v124_v54 }
  0xbd   :  { %3139 = vmatpush3.bf16.msra.mxu1 %v3882_v56 }
  0xbe   :  { %3380 = vmatprep.subr.bf16.mxu1 %v3883_v17 }
  0xc3   :  { %632 = vmatmul.mubr.bf16.gmra.mrb[56].mxu0 %v188_v61  ;;  %v136_v61 = vld [vmem:[%s5110_s0 + $0x2b0] sm:$0xff] }
  0xc4   :  { %641 = vmatprep.mubr.bf16.mxu0 %v192_v62  ;;  %v139_v62 = vld [vmem:[%s5110_s0 + $0x2c8] sm:$0xff] }
  0xc5   :  { %v190_v63 = vpack.c.bf16 %v139_v62, %v136_v61 }
  0xcb   :  { %642 = vmatmul.mubr.bf16.gmra.mrb[60].mxu0 %v191_v1  ;;  %v145_v1 = vld [vmem:[%s5110_s0 + $0x2f8] sm:$0xff] }
  0xcc   :  { %684 = vmatprep.mubr.bf16.mxu0 %v3958_v5  ;;  %v193_v2 = vpack.c.bf16 %v145_v1, %v142_v0 }
  0xd3   :  { %3044 = vmatmul.mubr.msk.bf16.vlgmr.msra.gmra.mrb[0].mxu0 %vm410_vm0, %v148_v9  ;;  %v4496_v9 = vrot.slane %v228_v7, %v232_v6 }
  0xd4   :  { %694 = vmatprep.mubr.bf16.mxu0 %v3958_v5 }
  0xdb   :  { %3045 = vmatmul.mubr.msk.bf16.gmra.mrb[4].mxu0 %vm410_vm0, %v151_v16 }
  0xdc   :  { %704 = vmatprep.mubr.bf16.mxu0 %v3958_v5 }
  0xe3   :  { %3046 = vmatmul.mubr.msk.bf16.gmra.mrb[8].mxu0 %vm410_vm0, %v154_v22 }
  0xe4   :  { %714 = vmatprep.mubr.bf16.mxu0 %v3958_v5 }
  0xeb   :  { %3047 = vmatmul.mubr.msk.bf16.gmra.mrb[12].mxu0 %vm410_vm0, %v157_v25 }
  0xec   :  { %724 = vmatprep.mubr.bf16.mxu0 %v3958_v5 }
  0xf3   :  { %3048 = vmatmul.mubr.msk.bf16.gmra.mrb[16].mxu0 %vm410_vm0, %v160_v28  ;;  %v3884_v28 = vld [vmem:[%s5113_s3 + $0x8] sm:$0xff]  }
  0xf4   :  { %734 = vmatprep.mubr.bf16.mxu0 %v3958_v5 }
  0xfb   :  { %3049 = vmatmul.mubr.msk.bf16.gmra.mrb[20].mxu0 %vm410_vm0, %v163_v31 }
  0xfc   :  { %744 = vmatprep.mubr.bf16.mxu0 %v3958_v5 }
 0x103   :  { %3050 = vmatmul.mubr.msk.bf16.gmra.mrb[24].mxu0 %vm410_vm0, %v166_v34 }
 0x104   :  { %754 = vmatprep.mubr.bf16.mxu0 %v3958_v5 }
 0x10b   :  { %3051 = vmatmul.mubr.msk.bf16.gmra.mrb[28].mxu0 %vm410_vm0, %v169_v37 }
 0x10c   :  { %764 = vmatprep.mubr.bf16.mxu0 %v3958_v5 }
 0x113   :  { %3052 = vmatmul.mubr.msk.bf16.gmra.mrb[32].mxu0 %vm410_vm0, %v172_v40 }
 0x114   :  { %774 = vmatprep.mubr.bf16.mxu0 %v3958_v5 }
 0x11b   :  { %3053 = vmatmul.mubr.msk.bf16.gmra.mrb[36].mxu0 %vm410_vm0, %v175_v43 }
 0x11c   :  { %784 = vmatprep.mubr.bf16.mxu0 %v3958_v5 }
 0x123   :  { %3054 = vmatmul.mubr.msk.bf16.gmra.mrb[40].mxu0 %vm410_vm0, %v178_v46 }
 0x124   :  { %794 = vmatprep.mubr.bf16.mxu0 %v3958_v5 }
 0x12b   :  { %3055 = vmatmul.mubr.msk.bf16.gmra.mrb[44].mxu0 %vm410_vm0, %v181_v50 }
 0x12c   :  { %804 = vmatprep.mubr.bf16.mxu0 %v3958_v5 }
 0x133   :  { %3056 = vmatmul.mubr.msk.bf16.gmra.mrb[48].mxu0 %vm410_vm0, %v184_v57 }
 0x134   :  { %814 = vmatprep.mubr.bf16.mxu0 %v3958_v5 }
 0x13b   :  { %3057 = vmatmul.mubr.msk.bf16.gmra.mrb[52].mxu0 %vm410_vm0, %v187_v60 }
 0x13c   :  { %824 = vmatprep.mubr.bf16.mxu0 %v3958_v5 }
 0x143   :  { %3058 = vmatmul.mubr.msk.bf16.gmra.mrb[56].mxu0 %vm410_vm0, %v190_v63 }
 0x144   :  { %834 = vmatprep.mubr.bf16.mxu0 %v3958_v5 }
 0x14b   :  { %3059 = vmatmul.mubr.msk.bf16.gmra.mrb[60].mxu0 %vm410_vm0, %v193_v2 }
 0x1a6   :  { %v686_v5 = vpop.f32.mrb[0].mxu0 }
 0x1a7   :  { %v3684_v11 = vadd.f32 %v686_v5, %v4496_v9  ;;  %v688_v12 = vpop.f32.mrb[1].mxu0 }
 0x1a8   :  { %v3685_v13 = vadd.f32 %v688_v12, %v4498_v10  ;;  %v690_v14 = vpop.f32.mrb[2].mxu0 }
 0x1a9   :  { %v3686_v15 = vadd.f32 %v690_v14, %v4496_v9  ;;  %v692_v16 = vpop.f32.mrb[3].mxu0  ;;  %v845_v19 = vmax.f32 %v3684_v11, 0.0 }
 0x1aa   :  { %v3687_v18 = vadd.f32 %v692_v16, %v4498_v10  ;;  %v846_v21 = vmax.f32 %v3685_v13, 0.0 }
 0x1ab   :  { %v847_v20 = vmax.f32 %v3686_v15, 0.0 }
 0x1ac   :  { %v848_v22 = vmax.f32 %v3687_v18, 0.0 }
 0x1ad   :  { %v909_v23 = vpack.c.bf16 %v847_v20, %v845_v19 }
 0x1ae   :  { %v696_v24 = vpop.f32.mrb[4].mxu0  ;;  %v910_v25 = vpack.c.bf16 %v848_v22, %v846_v21 }
 0x1af   :  { %v3688_v26 = vadd.f32 %v696_v24, %v4496_v9  ;;  %v698_v27 = vpop.f32.mrb[5].mxu0 }
 0x1b0   :  { %v3689_v29 = vadd.f32 %v698_v27, %v4498_v10  ;;  %v700_v30 = vpop.f32.mrb[6].mxu0  ;;  %1102 = vmatprep.mubr.bf16.mxu1 %v910_v25 }
 0x1b1   :  { %v3690_v31 = vadd.f32 %v700_v30, %v4496_v9  ;;  %v702_v32 = vpop.f32.mrb[7].mxu0  ;;  %1103 = vmatmul.mubr.bf16.vlgmr.msra.gmra.mrb[0].mxu1 %v909_v23  ;;  %v849_v34 = vmax.f32 %v3688_v26, 0.0 }
 0x1b2   :  { %v3691_v33 = vadd.f32 %v702_v32, %v4498_v10  ;;  %3381 = vmatpush3.bf16.msra.mxu1 %v3883_v17  ;;  %v850_v37 = vmax.f32 %v3689_v29, 0.0 }
 0x1b3   :  { %v851_v35 = vmax.f32 %v3690_v31, 0.0  ;;  %3382 = vmatprep.subr.bf16.mxu1 %v3884_v28 }
 0x1b4   :  { %v852_v38 = vmax.f32 %v3691_v33, 0.0 }
 0x1b5   :  { %v911_v39 = vpack.c.bf16 %v851_v35, %v849_v34 }
 0x1b6   :  { %v912_v40 = vpack.c.bf16 %v852_v38, %v850_v37  ;;  %v706_v41 = vpop.f32.mrb[8].mxu0  ;;  %3383 = vmatpush3.bf16.msra.mxu1 %v3884_v28 }
 0x1b7   :  { %v3692_v42 = vadd.f32 %v706_v41, %v4496_v9  ;;  %v708_v43 = vpop.f32.mrb[9].mxu0  ;;  %3384 = vmatprep.subr.bf16.mxu1 %v3885_v36 }
 0x1b8   :  { %v3693_v45 = vadd.f32 %v708_v43, %v4498_v10  ;;  %v710_v46 = vpop.f32.mrb[10].mxu0  ;;  %1110 = vmatprep.mubr.bf16.mxu1 %v912_v40 }
 0x1b9   :  { %v3694_v47 = vadd.f32 %v710_v46, %v4496_v9  ;;  %v712_v48 = vpop.f32.mrb[11].mxu0  ;;  %1111 = vmatmul.mubr.bf16.gmra.mrb[4].mxu1 %v911_v39  ;;  %v853_v50 = vmax.f32 %v3692_v42, 0.0 }
 0x1ba   :  { %v3695_v49 = vadd.f32 %v712_v48, %v4498_v10  ;;  %3385 = vmatpush3.bf16.msra.mxu1 %v3885_v36  ;;  %v854_v52 = vmax.f32 %v3693_v45, 0.0 }
 0x1bb   :  { %v855_v51 = vmax.f32 %v3694_v47, 0.0  ;;  %3386 = vmatprep.subr.bf16.mxu1 %v3886_v44 }
 0x1bc   :  { %v856_v53 = vmax.f32 %v3695_v49, 0.0 }
 0x1bd   :  { %v913_v54 = vpack.c.bf16 %v855_v51, %v853_v50 }
 0x1be   :  { %v914_v55 = vpack.c.bf16 %v856_v53, %v854_v52  ;;  %v716_v56 = vpop.f32.mrb[12].mxu0  ;;  %3387 = vmatpush3.bf16.msra.mxu1 %v3886_v44 }
 0x1bf   :  { %v3696_v57 = vadd.f32 %v716_v56, %v4496_v9  ;;  %v718_v58 = vpop.f32.mrb[13].mxu0 }
 0x1c0   :  { %v3697_v59 = vadd.f32 %v718_v58, %v4498_v10  ;;  %v720_v60 = vpop.f32.mrb[14].mxu0  ;;  %1118 = vmatprep.mubr.bf16.mxu1 %v914_v55 }
 0x1c1   :  { %v3698_v61 = vadd.f32 %v720_v60, %v4496_v9  ;;  %v722_v62 = vpop.f32.mrb[15].mxu0  ;;  %1119 = vmatmul.mubr.bf16.gmra.mrb[8].mxu1 %v913_v54  ;;  %v857_v0 = vmax.f32 %v3696_v57, 0.0 }
 0x1c2   :  { %v3699_v63 = vadd.f32 %v722_v62, %v4498_v10  ;;  %v858_v2 = vmax.f32 %v3697_v59, 0.0 }
 0x1c3   :  { %v859_v1 = vmax.f32 %v3698_v61, 0.0 }
 0x1c4   :  { %v860_v3 = vmax.f32 %v3699_v63, 0.0 }
 0x1c5   :  { %v915_v4 = vpack.c.bf16 %v859_v1, %v857_v0 }
 0x1c6   :  { %v916_v6 = vpack.c.bf16 %v860_v3, %v858_v2  ;;  %v726_v7 = vpop.f32.mrb[16].mxu0 }
 0x1c7   :  { %v3700_v8 = vadd.f32 %v726_v7, %v4496_v9  ;;  %v728_v5 = vpop.f32.mrb[17].mxu0 }
 0x1c8   :  { %v3701_v11 = vadd.f32 %v728_v5, %v4498_v10  ;;  %v730_v12 = vpop.f32.mrb[18].mxu0  ;;  %1126 = vmatprep.mubr.bf16.mxu1 %v916_v6 }
 0x1c9   :  { %v3702_v13 = vadd.f32 %v730_v12, %v4496_v9  ;;  %v732_v14 = vpop.f32.mrb[19].mxu0  ;;  %1127 = vmatmul.mubr.bf16.gmra.mrb[12].mxu1 %v915_v4  ;;  %v861_v16 = vmax.f32 %v3700_v8, 0.0 }
 0x1ca   :  { %v3703_v15 = vadd.f32 %v732_v14, %v4498_v10  ;;  %v862_v18 = vmax.f32 %v3701_v11, 0.0 }
 0x1cb   :  { %v863_v17 = vmax.f32 %v3702_v13, 0.0 }
 0x1cc   :  { %v864_v19 = vmax.f32 %v3703_v15, 0.0 }
 0x1cd   :  { %v917_v20 = vpack.c.bf16 %v863_v17, %v861_v16 }
 0x1ce   :  { %v918_v21 = vpack.c.bf16 %v864_v19, %v862_v18  ;;  %v736_v22 = vpop.f32.mrb[20].mxu0 }
 0x1cf   :  { %v3704_v23 = vadd.f32 %v736_v22, %v4496_v9  ;;  %v738_v24 = vpop.f32.mrb[21].mxu0 }
 0x1d0   :  { %v3705_v25 = vadd.f32 %v738_v24, %v4498_v10  ;;  %v740_v26 = vpop.f32.mrb[22].mxu0  ;;  %1134 = vmatprep.mubr.bf16.mxu1 %v918_v21 }
 0x1d1   :  { %v3706_v27 = vadd.f32 %v740_v26, %v4496_v9  ;;  %v742_v28 = vpop.f32.mrb[23].mxu0  ;;  %1135 = vmatmul.mubr.bf16.gmra.mrb[16].mxu1 %v917_v20  ;;  %v865_v30 = vmax.f32 %v3704_v23, 0.0 }
 0x1d2   :  { %v3707_v29 = vadd.f32 %v742_v28, %v4498_v10  ;;  %v866_v32 = vmax.f32 %v3705_v25, 0.0 }
 0x1d3   :  { %v867_v31 = vmax.f32 %v3706_v27, 0.0 }
 0x1d4   :  { %v868_v33 = vmax.f32 %v3707_v29, 0.0 }
 0x1d5   :  { %v919_v34 = vpack.c.bf16 %v867_v31, %v865_v30 }
 0x1d6   :  { %v920_v35 = vpack.c.bf16 %v868_v33, %v866_v32  ;;  %v746_v36 = vpop.f32.mrb[24].mxu0 }
 0x1d7   :  { %v3708_v37 = vadd.f32 %v746_v36, %v4496_v9  ;;  %v748_v38 = vpop.f32.mrb[25].mxu0 }
 0x1d8   :  { %v3709_v39 = vadd.f32 %v748_v38, %v4498_v10  ;;  %v750_v40 = vpop.f32.mrb[26].mxu0  ;;  %1142 = vmatprep.mubr.bf16.mxu1 %v920_v35 }
 0x1d9   :  { %v3710_v41 = vadd.f32 %v750_v40, %v4496_v9  ;;  %v752_v42 = vpop.f32.mrb[27].mxu0  ;;  %1143 = vmatmul.mubr.bf16.gmra.mrb[20].mxu1 %v919_v34  ;;  %v869_v44 = vmax.f32 %v3708_v37, 0.0 }
 0x1da   :  { %v3711_v43 = vadd.f32 %v752_v42, %v4498_v10  ;;  %v870_v46 = vmax.f32 %v3709_v39, 0.0 }
 0x1db   :  { %v871_v45 = vmax.f32 %v3710_v41, 0.0 }
 0x1dc   :  { %v872_v47 = vmax.f32 %v3711_v43, 0.0 }
 0x1dd   :  { %v921_v48 = vpack.c.bf16 %v871_v45, %v869_v44 }
 0x1de   :  { %v922_v49 = vpack.c.bf16 %v872_v47, %v870_v46  ;;  %v756_v50 = vpop.f32.mrb[28].mxu0 }
 0x1df   :  { %v3712_v51 = vadd.f32 %v756_v50, %v4496_v9  ;;  %v758_v52 = vpop.f32.mrb[29].mxu0 }
 0x1e0   :  { %v3713_v53 = vadd.f32 %v758_v52, %v4498_v10  ;;  %v760_v54 = vpop.f32.mrb[30].mxu0  ;;  %1150 = vmatprep.mubr.bf16.mxu1 %v922_v49 }
 0x1e1   :  { %v3714_v55 = vadd.f32 %v760_v54, %v4496_v9  ;;  %v762_v56 = vpop.f32.mrb[31].mxu0  ;;  %1151 = vmatmul.mubr.bf16.gmra.mrb[24].mxu1 %v921_v48  ;;  %v873_v58 = vmax.f32 %v3712_v51, 0.0 }
 0x1e2   :  { %v3715_v57 = vadd.f32 %v762_v56, %v4498_v10  ;;  %v874_v60 = vmax.f32 %v3713_v53, 0.0 }
 0x1e3   :  { %v875_v59 = vmax.f32 %v3714_v55, 0.0 }
 0x1e4   :  { %v876_v61 = vmax.f32 %v3715_v57, 0.0 }
 0x1e5   :  { %v923_v62 = vpack.c.bf16 %v875_v59, %v873_v58  ;;  %v3887_v59 = vld [vmem:[%s5113_s3 + $0x20] sm:$0xff]  }
 0x1e6   :  { %v924_v63 = vpack.c.bf16 %v876_v61, %v874_v60  ;;  %v766_v0 = vpop.f32.mrb[32].mxu0  ;;  %3388 = vmatprep.subr.bf16.mxu1 %v3887_v59 }
 0x1e7   :  { %v3716_v1 = vadd.f32 %v766_v0, %v4496_v9  ;;  %v768_v2 = vpop.f32.mrb[33].mxu0  ;;  %3389 = vmatpush3.bf16.msra.mxu1 %v3887_v59 }
 0x1e8   :  { %v3717_v3 = vadd.f32 %v768_v2, %v4498_v10  ;;  %v770_v4 = vpop.f32.mrb[34].mxu0  ;;  %1158 = vmatprep.mubr.bf16.mxu1 %v924_v63 }
 0x1e9   :  { %v3718_v6 = vadd.f32 %v770_v4, %v4496_v9  ;;  %v772_v7 = vpop.f32.mrb[35].mxu0  ;;  %1159 = vmatmul.mubr.bf16.gmra.mrb[28].mxu1 %v923_v62  ;;  %v877_v5 = vmax.f32 %v3716_v1, 0.0 }
 0x1ea   :  { %v3719_v8 = vadd.f32 %v772_v7, %v4498_v10  ;;  %v878_v12 = vmax.f32 %v3717_v3, 0.0  ;;  %v3888_v3 = vld [vmem:[%s5113_s3 + $0x28] sm:$0xff]  }
 0x1eb   :  { %v879_v11 = vmax.f32 %v3718_v6, 0.0  ;;  %3390 = vmatprep.subr.bf16.mxu1 %v3888_v3 }
 0x1ec   :  { %v880_v13 = vmax.f32 %v3719_v8, 0.0  ;;  %3391 = vmatpush3.bf16.msra.mxu1 %v3888_v3 }
 0x1ed   :  { %v925_v14 = vpack.c.bf16 %v879_v11, %v877_v5 }
 0x1ee   :  { %v926_v15 = vpack.c.bf16 %v880_v13, %v878_v12  ;;  %v776_v16 = vpop.f32.mrb[36].mxu0  ;;  %v3889_v13 = vld [vmem:[%s5113_s3 + $0x30] sm:$0xff]  }
 0x1ef   :  { %v3720_v17 = vadd.f32 %v776_v16, %v4496_v9  ;;  %v778_v18 = vpop.f32.mrb[37].mxu0  ;;  %3392 = vmatprep.subr.bf16.mxu1 %v3889_v13 }
 0x1f0   :  { %v3721_v19 = vadd.f32 %v778_v18, %v4498_v10  ;;  %v780_v20 = vpop.f32.mrb[38].mxu0  ;;  %1166 = vmatprep.mubr.bf16.mxu1 %v926_v15  ;;  %3393 = vmatpush3.bf16.msra.mxu1 %v3889_v13 }
 0x1f1   :  { %v3722_v21 = vadd.f32 %v780_v20, %v4496_v9  ;;  %v782_v22 = vpop.f32.mrb[39].mxu0  ;;  %1167 = vmatmul.mubr.bf16.gmra.mrb[32].mxu1 %v925_v14  ;;  %v881_v24 = vmax.f32 %v3720_v17, 0.0 }
 0x1f2   :  { %v3723_v23 = vadd.f32 %v782_v22, %v4498_v10  ;;  %v882_v26 = vmax.f32 %v3721_v19, 0.0 }
 0x1f3   :  { %v883_v25 = vmax.f32 %v3722_v21, 0.0  ;;  %v3890_v21 = vld [vmem:[%s5113_s3 + $0x38] sm:$0xff]  }
 0x1f4   :  { %v884_v27 = vmax.f32 %v3723_v23, 0.0  ;;  %3394 = vmatprep.subr.bf16.mxu1 %v3890_v21 }
 0x1f5   :  { %v927_v28 = vpack.c.bf16 %v883_v25, %v881_v24  ;;  %3395 = vmatpush3.bf16.msra.mxu1 %v3890_v21 }
 0x1f6   :  { %v928_v29 = vpack.c.bf16 %v884_v27, %v882_v26  ;;  %v786_v30 = vpop.f32.mrb[40].mxu0 }
 0x1f7   :  { %v3724_v31 = vadd.f32 %v786_v30, %v4496_v9  ;;  %v788_v32 = vpop.f32.mrb[41].mxu0 }
 0x1f8   :  { %v3725_v33 = vadd.f32 %v788_v32, %v4498_v10  ;;  %v790_v34 = vpop.f32.mrb[42].mxu0  ;;  %1174 = vmatprep.mubr.bf16.mxu1 %v928_v29 }
 0x1f9   :  { %v3726_v35 = vadd.f32 %v790_v34, %v4496_v9  ;;  %v792_v36 = vpop.f32.mrb[43].mxu0  ;;  %1175 = vmatmul.mubr.bf16.gmra.mrb[36].mxu1 %v927_v28  ;;  %v885_v38 = vmax.f32 %v3724_v31, 0.0 }
 0x1fa   :  { %v3727_v37 = vadd.f32 %v792_v36, %v4498_v10  ;;  %v886_v40 = vmax.f32 %v3725_v33, 0.0 }
 0x1fb   :  { %v887_v39 = vmax.f32 %v3726_v35, 0.0 }
 0x1fc   :  { %v888_v41 = vmax.f32 %v3727_v37, 0.0 }
 0x1fd   :  { %v929_v42 = vpack.c.bf16 %v887_v39, %v885_v38 }
 0x1fe   :  { %v930_v43 = vpack.c.bf16 %v888_v41, %v886_v40  ;;  %v796_v44 = vpop.f32.mrb[44].mxu0 }
 0x1ff   :  { %v3728_v45 = vadd.f32 %v796_v44, %v4496_v9  ;;  %v798_v46 = vpop.f32.mrb[45].mxu0 }
 0x200   :  { %v3729_v47 = vadd.f32 %v798_v46, %v4498_v10  ;;  %v800_v48 = vpop.f32.mrb[46].mxu0  ;;  %1182 = vmatprep.mubr.bf16.mxu1 %v930_v43 }
 0x201   :  { %v3730_v49 = vadd.f32 %v800_v48, %v4496_v9  ;;  %v802_v50 = vpop.f32.mrb[47].mxu0  ;;  %1183 = vmatmul.mubr.bf16.gmra.mrb[40].mxu1 %v929_v42  ;;  %v889_v52 = vmax.f32 %v3728_v45, 0.0 }
 0x202   :  { %v3731_v51 = vadd.f32 %v802_v50, %v4498_v10  ;;  %v890_v54 = vmax.f32 %v3729_v47, 0.0 }
 0x203   :  { %v891_v53 = vmax.f32 %v3730_v49, 0.0 }
 0x204   :  { %v892_v55 = vmax.f32 %v3731_v51, 0.0 }
 0x205   :  { %v931_v56 = vpack.c.bf16 %v891_v53, %v889_v52 }
 0x206   :  { %v932_v57 = vpack.c.bf16 %v892_v55, %v890_v54  ;;  %v806_v58 = vpop.f32.mrb[48].mxu0 }
 0x207   :  { %v3732_v60 = vadd.f32 %v806_v58, %v4496_v9  ;;  %v808_v61 = vpop.f32.mrb[49].mxu0 }
 0x208   :  { %v3733_v62 = vadd.f32 %v808_v61, %v4498_v10  ;;  %v810_v63 = vpop.f32.mrb[50].mxu0  ;;  %1190 = vmatprep.mubr.bf16.mxu1 %v932_v57  ;;  %v4588_v57 = vld [vmem:[#allocation2 + $0x1] ss:$0 sm:$0xff] }
 0x209   :  { %v3734_v0 = vadd.f32 %v810_v63, %v4496_v9  ;;  %v812_v1 = vpop.f32.mrb[51].mxu0  ;;  %1191 = vmatmul.mubr.bf16.gmra.mrb[44].mxu1 %v931_v56  ;;  %v893_v4 = vmax.f32 %v3732_v60, 0.0 }
 0x20a   :  { %v3735_v2 = vadd.f32 %v812_v1, %v4498_v10  ;;  %v894_v7 = vmax.f32 %v3733_v62, 0.0 }
 0x20b   :  { %v895_v6 = vmax.f32 %v3734_v0, 0.0 }
 0x20c   :  { %v896_v8 = vmax.f32 %v3735_v2, 0.0 }
 0x20d   :  { %v933_v5 = vpack.c.bf16 %v895_v6, %v893_v4 }
 0x20e   :  { %v934_v11 = vpack.c.bf16 %v896_v8, %v894_v7  ;;  %v816_v12 = vpop.f32.mrb[52].mxu0 }
 0x20f   :  { %v3736_v14 = vadd.f32 %v816_v12, %v4496_v9  ;;  %v818_v15 = vpop.f32.mrb[53].mxu0 }
 0x210   :  { %v3737_v16 = vadd.f32 %v818_v15, %v4498_v10  ;;  %v820_v17 = vpop.f32.mrb[54].mxu0  ;;  %1198 = vmatprep.mubr.bf16.mxu1 %v934_v11 }
 0x211   :  { %v3738_v18 = vadd.f32 %v820_v17, %v4496_v9  ;;  %v822_v19 = vpop.f32.mrb[55].mxu0  ;;  %1199 = vmatmul.mubr.bf16.gmra.mrb[48].mxu1 %v933_v5  ;;  %v897_v22 = vmax.f32 %v3736_v14, 0.0 }
 0x212   :  { %v3739_v20 = vadd.f32 %v822_v19, %v4498_v10  ;;  %v898_v24 = vmax.f32 %v3737_v16, 0.0 }
 0x213   :  { %v899_v23 = vmax.f32 %v3738_v18, 0.0 }
 0x214   :  { %v900_v25 = vmax.f32 %v3739_v20, 0.0  ;;  %v3892_v20 = vld [vmem:[%s5114_s4 + $0x8] sm:$0xff]  }
 0x215   :  { %v935_v26 = vpack.c.bf16 %v899_v23, %v897_v22 }
 0x216   :  { %v936_v27 = vpack.c.bf16 %v900_v25, %v898_v24  ;;  %v826_v28 = vpop.f32.mrb[56].mxu0  ;;  %v3893_v25 = vld [vmem:[%s5114_s4 + $0x10] sm:$0xff]  }
 0x217   :  { %v3740_v29 = vadd.f32 %v826_v28, %v4496_v9  ;;  %v828_v30 = vpop.f32.mrb[57].mxu0 }
 0x218   :  { %v3741_v31 = vadd.f32 %v828_v30, %v4498_v10  ;;  %v830_v32 = vpop.f32.mrb[58].mxu0  ;;  %1206 = vmatprep.mubr.bf16.mxu1 %v936_v27 }
 0x219   :  { %v3742_v33 = vadd.f32 %v830_v32, %v4496_v9  ;;  %v832_v34 = vpop.f32.mrb[59].mxu0  ;;  %1207 = vmatmul.mubr.bf16.gmra.mrb[52].mxu1 %v935_v26  ;;  %v901_v36 = vmax.f32 %v3740_v29, 0.0 }
 0x21a   :  { %v3743_v35 = vadd.f32 %v832_v34, %v4498_v10  ;;  %v902_v38 = vmax.f32 %v3741_v31, 0.0 }
 0x21b   :  { %v903_v37 = vmax.f32 %v3742_v33, 0.0  ;;  %v3894_v33 = vld [vmem:[%s5114_s4 + $0x18] sm:$0xff]  }
 0x21c   :  { %v904_v39 = vmax.f32 %v3743_v35, 0.0 }
 0x21d   :  { %v937_v40 = vpack.c.bf16 %v903_v37, %v901_v36 }
 0x21e   :  { %v938_v41 = vpack.c.bf16 %v904_v39, %v902_v38  ;;  %v836_v42 = vpop.f32.mrb[60].mxu0  ;;  %v3895_v38 = vld [vmem:[%s5114_s4 + $0x20] sm:$0xff]  }
 0x21f   :  { %v3744_v43 = vadd.f32 %v836_v42, %v4496_v9  ;;  %v838_v44 = vpop.f32.mrb[61].mxu0 }
 0x220   :  { %v3745_v45 = vadd.f32 %v838_v44, %v4498_v10  ;;  %v840_v46 = vpop.f32.mrb[62].mxu0  ;;  %1214 = vmatprep.mubr.bf16.mxu1 %v938_v41 }
 0x221   :  { %v3746_v47 = vadd.f32 %v840_v46, %v4496_v9  ;;  %v842_v48 = vpop.f32.mrb[63].mxu0  ;;  %1215 = vmatmul.mubr.bf16.gmra.mrb[56].mxu1 %v937_v40  ;;  %v905_v50 = vmax.f32 %v3744_v43, 0.0  ;;  %v3896_v46 = vld [vmem:[%s5114_s4 + $0x28] sm:$0xff]  }
 0x222   :  { %v3747_v49 = vadd.f32 %v842_v48, %v4498_v10  ;;  %v906_v52 = vmax.f32 %v3745_v45, 0.0  ;;  %v3891_v10 = vld [vmem:[%s5114_s4] sm:$0xff]  }
 0x223   :  { %v907_v51 = vmax.f32 %v3746_v47, 0.0  ;;  %3428 = vmatprep.subr.bf16.mxu1 %v3891_v10 }
 0x224   :  { %v908_v53 = vmax.f32 %v3747_v49, 0.0 }
 0x225   :  { %v939_v54 = vpack.c.bf16 %v907_v51, %v905_v50 }
 0x226   :  { %v940_v55 = vpack.c.bf16 %v908_v53, %v906_v52 }
 0x228   :  { %1222 = vmatprep.mubr.bf16.mxu1 %v940_v55 }
 0x229   :  { %1223 = vmatmul.mubr.bf16.gmra.mrb[60].mxu1 %v939_v54 }
 0x284   :  { %v3140_v56 = vpop.f32.mrb[0].mxu1 }
 0x285   :  { %v3141_v58 = vpop.f32.mrb[1].mxu1 }
 0x286   :  { %v3142_v59 = vadd.f32 %v3141_v58, %v3140_v56  ;;  %v3143_v60 = vpop.f32.mrb[2].mxu1 }
 0x287   :  { %v3144_v61 = vpop.f32.mrb[3].mxu1 }
 0x288   :  { %v1105_v9 = vadd.f32 %v3142_v59, %v4588_v57  ;;  %v3145_v62 = vadd.f32 %v3144_v61, %v3143_v60 }
 0x28a   :  { %v1108_v63 = vadd.f32 %v3145_v62, %v4588_v57  ;;  %v1231_v0 = vmax.f32 %v1105_v9, 0.0 }
 0x28c   :  { %v1232_v1 = vmax.f32 %v1108_v63, 0.0  ;;  %v3146_v2 = vpop.f32.mrb[4].mxu1 }
 0x28d   :  { %v3147_v3 = vpop.f32.mrb[5].mxu1 }
 0x28e   :  { %v3148_v4 = vadd.f32 %v3147_v3, %v3146_v2  ;;  %v3149_v6 = vpop.f32.mrb[6].mxu1  ;;  %v1263_v7 = vpack.c.bf16 %v1232_v1, %v1231_v0 }
 0x28f   :  { %v3150_v8 = vpop.f32.mrb[7].mxu1 }
 0x290   :  { %v1113_v5 = vadd.f32 %v3148_v4, %v4588_v57  ;;  %v3151_v11 = vadd.f32 %v3150_v8, %v3149_v6  ;;  %3396 = vmatprep.mubr.bf16.mxu1 %v1263_v7 }
 0x292   :  { %v1116_v12 = vadd.f32 %v3151_v11, %v4588_v57  ;;  %v1233_v13 = vmax.f32 %v1113_v5, 0.0 }
 0x294   :  { %v1234_v14 = vmax.f32 %v1116_v12, 0.0  ;;  %v3152_v15 = vpop.f32.mrb[8].mxu1 }
 0x295   :  { %v3153_v16 = vpop.f32.mrb[9].mxu1 }
 0x296   :  { %v1264_v17 = vpack.c.bf16 %v1234_v14, %v1233_v13  ;;  %v3154_v18 = vadd.f32 %v3153_v16, %v3152_v15  ;;  %v3155_v19 = vpop.f32.mrb[10].mxu1 }
 0x297   :  { %v3156_v21 = vpop.f32.mrb[11].mxu1 }
 0x298   :  { %v1121_v22 = vadd.f32 %v3154_v18, %v4588_v57  ;;  %v3157_v23 = vadd.f32 %v3156_v21, %v3155_v19  ;;  %3397 = vmatmul.mubr.bf16.vlgmr.msra.gmra.mrb[64].mxu1 %v1264_v17 }
 0x299   :  { %3429 = vmatpush3.bf16.msra.mxu1 %v3891_v10 }
 0x29a   :  { %v1124_v24 = vadd.f32 %v3157_v23, %v4588_v57  ;;  %3430 = vmatprep.subr.bf16.mxu1 %v3892_v20  ;;  %v1235_v26 = vmax.f32 %v1121_v22, 0.0 }
 0x29c   :  { %v1236_v27 = vmax.f32 %v1124_v24, 0.0  ;;  %v3158_v28 = vpop.f32.mrb[12].mxu1 }
 0x29d   :  { %v3159_v29 = vpop.f32.mrb[13].mxu1  ;;  %3431 = vmatpush3.bf16.msra.mxu1 %v3892_v20 }
 0x29e   :  { %v3160_v30 = vadd.f32 %v3159_v29, %v3158_v28  ;;  %v3161_v31 = vpop.f32.mrb[14].mxu1  ;;  %v1265_v32 = vpack.c.bf16 %v1236_v27, %v1235_v26  ;;  %3432 = vmatprep.subr.bf16.mxu1 %v3893_v25 }
 0x29f   :  { %v3162_v34 = vpop.f32.mrb[15].mxu1 }
 0x2a0   :  { %v1129_v35 = vadd.f32 %v3160_v30, %v4588_v57  ;;  %v3163_v36 = vadd.f32 %v3162_v34, %v3161_v31  ;;  %3400 = vmatprep.mubr.bf16.mxu1 %v1265_v32 }
 0x2a1   :  { %3433 = vmatpush3.bf16.msra.mxu1 %v3893_v25 }
 0x2a2   :  { %v1132_v37 = vadd.f32 %v3163_v36, %v4588_v57  ;;  %3434 = vmatprep.subr.bf16.mxu1 %v3894_v33  ;;  %v1237_v39 = vmax.f32 %v1129_v35, 0.0 }
 0x2a4   :  { %v1238_v40 = vmax.f32 %v1132_v37, 0.0  ;;  %v3164_v41 = vpop.f32.mrb[16].mxu1 }
 0x2a5   :  { %v3165_v42 = vpop.f32.mrb[17].mxu1  ;;  %3435 = vmatpush3.bf16.msra.mxu1 %v3894_v33 }
 0x2a6   :  { %v3166_v43 = vadd.f32 %v3165_v42, %v3164_v41  ;;  %v3167_v44 = vpop.f32.mrb[18].mxu1  ;;  %v1266_v45 = vpack.c.bf16 %v1238_v40, %v1237_v39  ;;  %3436 = vmatprep.subr.bf16.mxu1 %v3895_v38 }
 0x2a7   :  { %v3168_v47 = vpop.f32.mrb[19].mxu1 }
 0x2a8   :  { %v1137_v48 = vadd.f32 %v3166_v43, %v4588_v57  ;;  %v3169_v49 = vadd.f32 %v3168_v47, %v3167_v44  ;;  %3401 = vmatmul.mubr.bf16.gmra.mrb[68].mxu1 %v1266_v45 }
 0x2a9   :  { %3437 = vmatpush3.bf16.msra.mxu1 %v3895_v38 }
 0x2aa   :  { %v1140_v50 = vadd.f32 %v3169_v49, %v4588_v57  ;;  %3438 = vmatprep.subr.bf16.mxu1 %v3896_v46  ;;  %v1239_v51 = vmax.f32 %v1137_v48, 0.0 }
 0x2ac   :  { %v1240_v52 = vmax.f32 %v1140_v50, 0.0  ;;  %v3170_v53 = vpop.f32.mrb[20].mxu1 }
 0x2ad   :  { %v3171_v54 = vpop.f32.mrb[21].mxu1  ;;  %3439 = vmatpush3.bf16.msra.mxu1 %v3896_v46 }
 0x2ae   :  { %v3172_v55 = vadd.f32 %v3171_v54, %v3170_v53  ;;  %v3173_v56 = vpop.f32.mrb[22].mxu1  ;;  %v1267_v58 = vpack.c.bf16 %v1240_v52, %v1239_v51 }
 0x2af   :  { %v3174_v59 = vpop.f32.mrb[23].mxu1 }
 0x2b0   :  { %v1145_v60 = vadd.f32 %v3172_v55, %v4588_v57  ;;  %v3175_v61 = vadd.f32 %v3174_v59, %v3173_v56  ;;  %3404 = vmatprep.mubr.bf16.mxu1 %v1267_v58 }
 0x2b2   :  { %v1148_v9 = vadd.f32 %v3175_v61, %v4588_v57  ;;  %v1241_v62 = vmax.f32 %v1145_v60, 0.0 }
 0x2b4   :  { %v1242_v10 = vmax.f32 %v1148_v9, 0.0  ;;  %v3176_v63 = vpop.f32.mrb[24].mxu1 }
 0x2b5   :  { %v3177_v0 = vpop.f32.mrb[25].mxu1 }
 0x2b6   :  { %v3178_v1 = vadd.f32 %v3177_v0, %v3176_v63  ;;  %v3179_v2 = vpop.f32.mrb[26].mxu1  ;;  %v1268_v3 = vpack.c.bf16 %v1242_v10, %v1241_v62 }
 0x2b7   :  { %v3180_v4 = vpop.f32.mrb[27].mxu1 }
 0x2b8   :  { %v1153_v6 = vadd.f32 %v3178_v1, %v4588_v57  ;;  %v3181_v7 = vadd.f32 %v3180_v4, %v3179_v2  ;;  %3405 = vmatmul.mubr.bf16.gmra.mrb[72].mxu1 %v1268_v3 }
 0x2ba   :  { %v1156_v8 = vadd.f32 %v3181_v7, %v4588_v57  ;;  %v1243_v5 = vmax.f32 %v1153_v6, 0.0 }
 0x2bc   :  { %v1244_v11 = vmax.f32 %v1156_v8, 0.0  ;;  %v3182_v12 = vpop.f32.mrb[28].mxu1 }
 0x2bd   :  { %v3183_v13 = vpop.f32.mrb[29].mxu1 }
 0x2be   :  { %v3184_v14 = vadd.f32 %v3183_v13, %v3182_v12  ;;  %v3185_v15 = vpop.f32.mrb[30].mxu1  ;;  %v1269_v16 = vpack.c.bf16 %v1244_v11, %v1243_v5 }
 0x2bf   :  { %v3186_v17 = vpop.f32.mrb[31].mxu1 }
 0x2c0   :  { %v1161_v18 = vadd.f32 %v3184_v14, %v4588_v57  ;;  %v3187_v19 = vadd.f32 %v3186_v17, %v3185_v15  ;;  %3408 = vmatprep.mubr.bf16.mxu1 %v1269_v16  ;;  %v3897_v16 = vld [vmem:[%s5114_s4 + $0x30] sm:$0xff]  }
 0x2c1   :  { %3440 = vmatprep.subr.bf16.mxu1 %v3897_v16 }
 0x2c2   :  { %v1164_v20 = vadd.f32 %v3187_v19, %v4588_v57  ;;  %v1245_v21 = vmax.f32 %v1161_v18, 0.0  ;;  %3441 = vmatpush3.bf16.msra.mxu1 %v3897_v16  ;;  %v3903_v16 = vld [vmem:[%s5115_s5 + $0x20] sm:$0xff]  }
 0x2c4   :  { %v1246_v22 = vmax.f32 %v1164_v20, 0.0  ;;  %v3188_v23 = vpop.f32.mrb[32].mxu1 }
 0x2c5   :  { %v3189_v24 = vpop.f32.mrb[33].mxu1 }
 0x2c6   :  { %v3190_v25 = vadd.f32 %v3189_v24, %v3188_v23  ;;  %v3191_v26 = vpop.f32.mrb[34].mxu1  ;;  %v1270_v27 = vpack.c.bf16 %v1246_v22, %v1245_v21  ;;  %v3898_v24 = vld [vmem:[%s5114_s4 + $0x38] sm:$0xff]  }
 0x2c7   :  { %v3192_v28 = vpop.f32.mrb[35].mxu1  ;;  %3442 = vmatprep.subr.bf16.mxu1 %v3898_v24 }
 0x2c8   :  { %v1169_v29 = vadd.f32 %v3190_v25, %v4588_v57  ;;  %v3193_v30 = vadd.f32 %v3192_v28, %v3191_v26  ;;  %3409 = vmatmul.mubr.bf16.gmra.mrb[76].mxu1 %v1270_v27 }
 0x2c9   :  { %3443 = vmatpush3.bf16.msra.mxu1 %v3898_v24 }
 0x2ca   :  { %v1172_v31 = vadd.f32 %v3193_v30, %v4588_v57  ;;  %v1247_v32 = vmax.f32 %v1169_v29, 0.0 }
 0x2cc   :  { %v1248_v33 = vmax.f32 %v1172_v31, 0.0  ;;  %v3194_v34 = vpop.f32.mrb[36].mxu1 }
 0x2cd   :  { %v3195_v35 = vpop.f32.mrb[37].mxu1 }
 0x2ce   :  { %v3196_v36 = vadd.f32 %v3195_v35, %v3194_v34  ;;  %v3197_v37 = vpop.f32.mrb[38].mxu1  ;;  %v1271_v38 = vpack.c.bf16 %v1248_v33, %v1247_v32 }
 0x2cf   :  { %v3198_v39 = vpop.f32.mrb[39].mxu1 }
 0x2d0   :  { %v1177_v40 = vadd.f32 %v3196_v36, %v4588_v57  ;;  %v3199_v41 = vadd.f32 %v3198_v39, %v3197_v37  ;;  %3412 = vmatprep.mubr.bf16.mxu1 %v1271_v38 }
 0x2d2   :  { %v1180_v42 = vadd.f32 %v3199_v41, %v4588_v57  ;;  %v1249_v43 = vmax.f32 %v1177_v40, 0.0 }
 0x2d4   :  { %v1250_v44 = vmax.f32 %v1180_v42, 0.0  ;;  %v3200_v45 = vpop.f32.mrb[40].mxu1 }
 0x2d5   :  { %v3201_v46 = vpop.f32.mrb[41].mxu1 }
 0x2d6   :  { %v3202_v47 = vadd.f32 %v3201_v46, %v3200_v45  ;;  %v3203_v48 = vpop.f32.mrb[42].mxu1  ;;  %v1272_v49 = vpack.c.bf16 %v1250_v44, %v1249_v43 }
 0x2d7   :  { %v3204_v50 = vpop.f32.mrb[43].mxu1 }
 0x2d8   :  { %v1185_v51 = vadd.f32 %v3202_v47, %v4588_v57  ;;  %v3205_v52 = vadd.f32 %v3204_v50, %v3203_v48  ;;  %3413 = vmatmul.mubr.bf16.gmra.mrb[80].mxu1 %v1272_v49 }
 0x2da   :  { %v1188_v53 = vadd.f32 %v3205_v52, %v4588_v57  ;;  %v1251_v54 = vmax.f32 %v1185_v51, 0.0  ;;  %v3899_v51 = vld [vmem:[%s5115_s5] sm:$0xff]  }
 0x2db   :  { %3476 = vmatprep.subr.bf16.mxu1 %v3899_v51  ;;  %v4649_v52 = vld [vmem:[#allocation2 + $0x2] ss:$0 sm:$0xff] }
 0x2dc   :  { %v1252_v55 = vmax.f32 %v1188_v53, 0.0  ;;  %v3206_v56 = vpop.f32.mrb[44].mxu1 }
 0x2dd   :  { %v3207_v58 = vpop.f32.mrb[45].mxu1 }
 0x2de   :  { %v3208_v59 = vadd.f32 %v3207_v58, %v3206_v56  ;;  %v3209_v60 = vpop.f32.mrb[46].mxu1  ;;  %v1273_v61 = vpack.c.bf16 %v1252_v55, %v1251_v54 }
 0x2df   :  { %v3210_v9 = vpop.f32.mrb[47].mxu1 }
 0x2e0   :  { %v1193_v62 = vadd.f32 %v3208_v59, %v4588_v57  ;;  %v3211_v10 = vadd.f32 %v3210_v9, %v3209_v60  ;;  %3416 = vmatprep.mubr.bf16.mxu1 %v1273_v61 }
 0x2e2   :  { %v1196_v63 = vadd.f32 %v3211_v10, %v4588_v57  ;;  %v1253_v0 = vmax.f32 %v1193_v62, 0.0 }
 0x2e4   :  { %v1254_v1 = vmax.f32 %v1196_v63, 0.0  ;;  %v3212_v2 = vpop.f32.mrb[48].mxu1 }
 0x2e5   :  { %v3213_v3 = vpop.f32.mrb[49].mxu1 }
 0x2e6   :  { %v3214_v4 = vadd.f32 %v3213_v3, %v3212_v2  ;;  %v3215_v6 = vpop.f32.mrb[50].mxu1  ;;  %v1274_v7 = vpack.c.bf16 %v1254_v1, %v1253_v0  ;;  %v3900_v1 = vld [vmem:[%s5115_s5 + $0x8] sm:$0xff]   ;;  %v3901_v2 = vld [vmem:[%s5115_s5 + $0x10] sm:$0xff]  }
 0x2e7   :  { %v3216_v8 = vpop.f32.mrb[51].mxu1 }
 0x2e8   :  { %v1201_v5 = vadd.f32 %v3214_v4, %v4588_v57  ;;  %v3217_v11 = vadd.f32 %v3216_v8, %v3215_v6  ;;  %3417 = vmatmul.mubr.bf16.gmra.mrb[84].mxu1 %v1274_v7  ;;  %v3902_v7 = vld [vmem:[%s5115_s5 + $0x18] sm:$0xff]  }
 0x2ea   :  { %v1204_v12 = vadd.f32 %v3217_v11, %v4588_v57  ;;  %v1255_v13 = vmax.f32 %v1201_v5, 0.0 }
 0x2ec   :  { %v1256_v14 = vmax.f32 %v1204_v12, 0.0  ;;  %v3218_v15 = vpop.f32.mrb[52].mxu1 }
 0x2ed   :  { %v3219_v17 = vpop.f32.mrb[53].mxu1 }
 0x2ee   :  { %v3220_v18 = vadd.f32 %v3219_v17, %v3218_v15  ;;  %v3221_v19 = vpop.f32.mrb[54].mxu1  ;;  %v1275_v20 = vpack.c.bf16 %v1256_v14, %v1255_v13 }
 0x2ef   :  { %v3222_v21 = vpop.f32.mrb[55].mxu1 }
 0x2f0   :  { %v1209_v22 = vadd.f32 %v3220_v18, %v4588_v57  ;;  %v3223_v23 = vadd.f32 %v3222_v21, %v3221_v19  ;;  %3420 = vmatprep.mubr.bf16.mxu1 %v1275_v20  ;;  %v3904_v21 = vld [vmem:[%s5115_s5 + $0x28] sm:$0xff]  }
 0x2f2   :  { %v1212_v25 = vadd.f32 %v3223_v23, %v4588_v57  ;;  %v1257_v26 = vmax.f32 %v1209_v22, 0.0 }
 0x2f4   :  { %v1258_v27 = vmax.f32 %v1212_v25, 0.0  ;;  %v3224_v28 = vpop.f32.mrb[56].mxu1 }
 0x2f5   :  { %v3225_v29 = vpop.f32.mrb[57].mxu1 }
 0x2f6   :  { %v3226_v30 = vadd.f32 %v3225_v29, %v3224_v28  ;;  %v3227_v31 = vpop.f32.mrb[58].mxu1  ;;  %v1276_v32 = vpack.c.bf16 %v1258_v27, %v1257_v26 }
 0x2f7   :  { %v3228_v33 = vpop.f32.mrb[59].mxu1 }
 0x2f8   :  { %v1217_v34 = vadd.f32 %v3226_v30, %v4588_v57  ;;  %v3229_v35 = vadd.f32 %v3228_v33, %v3227_v31  ;;  %3421 = vmatmul.mubr.bf16.gmra.mrb[88].mxu1 %v1276_v32 }
 0x2fa   :  { %v1220_v36 = vadd.f32 %v3229_v35, %v4588_v57  ;;  %v1259_v37 = vmax.f32 %v1217_v34, 0.0 }
 0x2fc   :  { %v1260_v38 = vmax.f32 %v1220_v36, 0.0  ;;  %v3230_v39 = vpop.f32.mrb[60].mxu1 }
 0x2fd   :  { %v3231_v40 = vpop.f32.mrb[61].mxu1 }
 0x2fe   :  { %v3232_v41 = vadd.f32 %v3231_v40, %v3230_v39  ;;  %v3233_v42 = vpop.f32.mrb[62].mxu1  ;;  %v1277_v43 = vpack.c.bf16 %v1260_v38, %v1259_v37 }
 0x2ff   :  { %v3234_v44 = vpop.f32.mrb[63].mxu1 }
 0x300   :  { %v1225_v45 = vadd.f32 %v3232_v41, %v4588_v57  ;;  %v3235_v46 = vadd.f32 %v3234_v44, %v3233_v42  ;;  %3424 = vmatprep.mubr.bf16.mxu1 %v1277_v43 }
 0x302   :  { %v1228_v47 = vadd.f32 %v3235_v46, %v4588_v57  ;;  %v1261_v48 = vmax.f32 %v1225_v45, 0.0 }
 0x304   :  { %v1262_v49 = vmax.f32 %v1228_v47, 0.0 }
 0x306   :  { %v1278_v50 = vpack.c.bf16 %v1262_v49, %v1261_v48 }
 0x308   :  { %3425 = vmatmul.mubr.bf16.gmra.mrb[92].mxu1 %v1278_v50 }
 0x36b   :  { %v3398_v53 = vpop.f32.mrb[64].mxu1 }
 0x36c   :  { %v1387_v54 = vadd.f32 %v3398_v53, %v4649_v52  ;;  %v1378_v55 = vpop.f32.mrb[65].mxu1 }
 0x36d   :  { %v1379_v56 = vadd.f32 %v1378_v55, %v4649_v52  ;;  %v3399_v58 = vpop.f32.mrb[66].mxu1 }
 0x36e   :  { %v1390_v57 = vadd.f32 %v3399_v58, %v4649_v52  ;;  %v1381_v59 = vpop.f32.mrb[67].mxu1  ;;  %v1507_v61 = vmax.f32 %v1387_v54, 0.0 }
 0x36f   :  { %v1382_v60 = vadd.f32 %v1381_v59, %v4649_v52  ;;  %v1505_v62 = vmax.f32 %v1379_v56, 0.0 }
 0x370   :  { %v1508_v9 = vmax.f32 %v1390_v57, 0.0 }
 0x371   :  { %v1506_v10 = vmax.f32 %v1382_v60, 0.0 }
 0x372   :  { %v1538_v63 = vpack.c.bf16 %v1508_v9, %v1507_v61 }
 0x373   :  { %v1537_v0 = vpack.c.bf16 %v1506_v10, %v1505_v62 }
 0x375   :  { %3444 = vmatprep.mubr.bf16.mxu1 %v1537_v0 }
 0x376   :  { %3445 = vmatmul.mubr.bf16.vlgmr.msra.gmra.mrb[96].mxu1 %v1538_v63 }
 0x377   :  { %3477 = vmatpush3.bf16.msra.mxu1 %v3899_v51 }
 0x378   :  { %3478 = vmatprep.subr.bf16.mxu1 %v3900_v1 }
 0x37b   :  { %v3402_v3 = vpop.f32.mrb[68].mxu1  ;;  %3479 = vmatpush3.bf16.msra.mxu1 %v3900_v1 }
 0x37c   :  { %v1403_v4 = vadd.f32 %v3402_v3, %v4649_v52  ;;  %v1394_v6 = vpop.f32.mrb[69].mxu1  ;;  %3480 = vmatprep.subr.bf16.mxu1 %v3901_v2 }
 0x37d   :  { %v1395_v8 = vadd.f32 %v1394_v6, %v4649_v52  ;;  %v3403_v5 = vpop.f32.mrb[70].mxu1 }
 0x37e   :  { %v1406_v11 = vadd.f32 %v3403_v5, %v4649_v52  ;;  %v1397_v12 = vpop.f32.mrb[71].mxu1  ;;  %v1511_v14 = vmax.f32 %v1403_v4, 0.0 }
 0x37f   :  { %v1398_v13 = vadd.f32 %v1397_v12, %v4649_v52  ;;  %3481 = vmatpush3.bf16.msra.mxu1 %v3901_v2  ;;  %v1509_v17 = vmax.f32 %v1395_v8, 0.0 }
 0x380   :  { %v1512_v15 = vmax.f32 %v1406_v11, 0.0  ;;  %3482 = vmatprep.subr.bf16.mxu1 %v3902_v7 }
 0x381   :  { %v1510_v18 = vmax.f32 %v1398_v13, 0.0 }
 0x382   :  { %v1540_v19 = vpack.c.bf16 %v1512_v15, %v1511_v14  ;;  %v3905_v15 = vld [vmem:[%s5115_s5 + $0x30] sm:$0xff]  }
 0x383   :  { %v1539_v20 = vpack.c.bf16 %v1510_v18, %v1509_v17  ;;  %3483 = vmatpush3.bf16.msra.mxu1 %v3902_v7 }
 0x384   :  { %3484 = vmatprep.subr.bf16.mxu1 %v3903_v16 }
 0x385   :  { %3448 = vmatprep.mubr.bf16.mxu1 %v1539_v20 }
 0x386   :  { %3449 = vmatmul.mubr.bf16.gmra.mrb[100].mxu1 %v1540_v19 }
 0x387   :  { %3485 = vmatpush3.bf16.msra.mxu1 %v3903_v16 }
 0x388   :  { %3486 = vmatprep.subr.bf16.mxu1 %v3904_v21 }
 0x38b   :  { %v3406_v22 = vpop.f32.mrb[72].mxu1  ;;  %3487 = vmatpush3.bf16.msra.mxu1 %v3904_v21 }
 0x38c   :  { %v1419_v23 = vadd.f32 %v3406_v22, %v4649_v52  ;;  %v1410_v24 = vpop.f32.mrb[73].mxu1  ;;  %3488 = vmatprep.subr.bf16.mxu1 %v3905_v15 }
 0x38d   :  { %v1411_v25 = vadd.f32 %v1410_v24, %v4649_v52  ;;  %v3407_v26 = vpop.f32.mrb[74].mxu1 }
 0x38e   :  { %v1422_v27 = vadd.f32 %v3407_v26, %v4649_v52  ;;  %v1413_v28 = vpop.f32.mrb[75].mxu1  ;;  %v1515_v30 = vmax.f32 %v1419_v23, 0.0  ;;  %v3906_v23 = vld [vmem:[%s5115_s5 + $0x38] sm:$0xff]  }
 0x38f   :  { %v1414_v29 = vadd.f32 %v1413_v28, %v4649_v52  ;;  %v1513_v32 = vmax.f32 %v1411_v25, 0.0  ;;  %3489 = vmatpush3.bf16.msra.mxu1 %v3905_v15 }
 0x390   :  { %v1516_v31 = vmax.f32 %v1422_v27, 0.0  ;;  %3490 = vmatprep.subr.bf16.mxu1 %v3906_v23 }
 0x391   :  { %v1514_v33 = vmax.f32 %v1414_v29, 0.0 }
 0x392   :  { %v1542_v34 = vpack.c.bf16 %v1516_v31, %v1515_v30 }
 0x393   :  { %v1541_v35 = vpack.c.bf16 %v1514_v33, %v1513_v32  ;;  %3491 = vmatpush3.bf16.msra.mxu1 %v3906_v23 }
 0x395   :  { %3452 = vmatprep.mubr.bf16.mxu1 %v1541_v35 }
 0x396   :  { %3453 = vmatmul.mubr.bf16.gmra.mrb[104].mxu1 %v1542_v34 }
 0x39b   :  { %v3410_v36 = vpop.f32.mrb[76].mxu1 }
 0x39c   :  { %v1435_v37 = vadd.f32 %v3410_v36, %v4649_v52  ;;  %v1426_v38 = vpop.f32.mrb[77].mxu1 }
 0x39d   :  { %v1427_v39 = vadd.f32 %v1426_v38, %v4649_v52  ;;  %v3411_v40 = vpop.f32.mrb[78].mxu1 }
 0x39e   :  { %v1438_v41 = vadd.f32 %v3411_v40, %v4649_v52  ;;  %v1429_v42 = vpop.f32.mrb[79].mxu1  ;;  %v1519_v44 = vmax.f32 %v1435_v37, 0.0 }
 0x39f   :  { %v1430_v43 = vadd.f32 %v1429_v42, %v4649_v52  ;;  %v1517_v46 = vmax.f32 %v1427_v39, 0.0 }
 0x3a0   :  { %v1520_v45 = vmax.f32 %v1438_v41, 0.0 }
 0x3a1   :  { %v1518_v47 = vmax.f32 %v1430_v43, 0.0 }
 0x3a2   :  { %v1544_v48 = vpack.c.bf16 %v1520_v45, %v1519_v44  ;;  %v3907_v45 = vld [vmem:[%s5116_s6] sm:$0xff]  }
 0x3a3   :  { %v1543_v49 = vpack.c.bf16 %v1518_v47, %v1517_v46  ;;  %v3908_v46 = vld [vmem:[%s5116_s6 + $0x8] sm:$0xff]   ;;  %3524 = vmatprep.subr.bf16.mxu0 %v3907_v45  ;;  %v4710_v47 = vld [vmem:[#allocation2 + $0x3] ss:$0 sm:$0xff] }
 0x3a4   :  { %3525 = vmatpush3.bf16.msra.mxu0 %v3907_v45 }
 0x3a5   :  { %3456 = vmatprep.mubr.bf16.mxu1 %v1543_v49  ;;  %3526 = vmatprep.subr.bf16.mxu0 %v3908_v46 }
 0x3a6   :  { %3457 = vmatmul.mubr.bf16.gmra.mrb[108].mxu1 %v1544_v48 }
 0x3a8   :  { %3527 = vmatpush3.bf16.msra.mxu0 %v3908_v46 }
 0x3ab   :  { %v3414_v50 = vpop.f32.mrb[80].mxu1 }
 0x3ac   :  { %v1451_v51 = vadd.f32 %v3414_v50, %v4649_v52  ;;  %v1442_v53 = vpop.f32.mrb[81].mxu1 }
 0x3ad   :  { %v1443_v54 = vadd.f32 %v1442_v53, %v4649_v52  ;;  %v3415_v55 = vpop.f32.mrb[82].mxu1 }
 0x3ae   :  { %v1454_v56 = vadd.f32 %v3415_v55, %v4649_v52  ;;  %v1445_v58 = vpop.f32.mrb[83].mxu1  ;;  %v1523_v59 = vmax.f32 %v1451_v51, 0.0 }
 0x3af   :  { %v1446_v57 = vadd.f32 %v1445_v58, %v4649_v52  ;;  %v1521_v61 = vmax.f32 %v1443_v54, 0.0 }
 0x3b0   :  { %v1524_v60 = vmax.f32 %v1454_v56, 0.0  ;;  %v3910_v56 = vld [vmem:[%s5116_s6 + $0x18] sm:$0xff]  }
 0x3b1   :  { %v1522_v9 = vmax.f32 %v1446_v57, 0.0 }
 0x3b2   :  { %v1546_v62 = vpack.c.bf16 %v1524_v60, %v1523_v59 }
 0x3b3   :  { %v1545_v10 = vpack.c.bf16 %v1522_v9, %v1521_v61 }
 0x3b5   :  { %3460 = vmatprep.mubr.bf16.mxu1 %v1545_v10 }
 0x3b6   :  { %3461 = vmatmul.mubr.bf16.gmra.mrb[112].mxu1 %v1546_v62  ;;  %v3911_v62 = vld [vmem:[%s5116_s6 + $0x20] sm:$0xff]  }
 0x3bb   :  { %v3418_v63 = vpop.f32.mrb[84].mxu1 }
 0x3bc   :  { %v1467_v0 = vadd.f32 %v3418_v63, %v4649_v52  ;;  %v1458_v1 = vpop.f32.mrb[85].mxu1  ;;  %v3912_v63 = vld [vmem:[%s5116_s6 + $0x28] sm:$0xff]  }
 0x3bd   :  { %v1459_v2 = vadd.f32 %v1458_v1, %v4649_v52  ;;  %v3419_v3 = vpop.f32.mrb[86].mxu1 }
 0x3be   :  { %v1470_v4 = vadd.f32 %v3419_v3, %v4649_v52  ;;  %v1461_v6 = vpop.f32.mrb[87].mxu1  ;;  %v1527_v8 = vmax.f32 %v1467_v0, 0.0 }
 0x3bf   :  { %v1462_v7 = vadd.f32 %v1461_v6, %v4649_v52  ;;  %v1525_v11 = vmax.f32 %v1459_v2, 0.0 }
 0x3c0   :  { %v1528_v5 = vmax.f32 %v1470_v4, 0.0 }
 0x3c1   :  { %v1526_v12 = vmax.f32 %v1462_v7, 0.0 }
 0x3c2   :  { %v1548_v13 = vpack.c.bf16 %v1528_v5, %v1527_v8 }
 0x3c3   :  { %v1547_v14 = vpack.c.bf16 %v1526_v12, %v1525_v11 }
 0x3c5   :  { %3464 = vmatprep.mubr.bf16.mxu1 %v1547_v14 }
 0x3c6   :  { %3465 = vmatmul.mubr.bf16.gmra.mrb[116].mxu1 %v1548_v13 }
 0x3cb   :  { %v3422_v16 = vpop.f32.mrb[88].mxu1 }
 0x3cc   :  { %v1483_v17 = vadd.f32 %v3422_v16, %v4649_v52  ;;  %v1474_v18 = vpop.f32.mrb[89].mxu1 }
 0x3cd   :  { %v1475_v19 = vadd.f32 %v1474_v18, %v4649_v52  ;;  %v3423_v20 = vpop.f32.mrb[90].mxu1 }
 0x3ce   :  { %v1486_v21 = vadd.f32 %v3423_v20, %v4649_v52  ;;  %v1477_v22 = vpop.f32.mrb[91].mxu1  ;;  %v1531_v25 = vmax.f32 %v1483_v17, 0.0 }
 0x3cf   :  { %v1478_v24 = vadd.f32 %v1477_v22, %v4649_v52  ;;  %v1529_v27 = vmax.f32 %v1475_v19, 0.0 }
 0x3d0   :  { %v1532_v26 = vmax.f32 %v1486_v21, 0.0 }
 0x3d1   :  { %v1530_v28 = vmax.f32 %v1478_v24, 0.0 }
 0x3d2   :  { %v1550_v29 = vpack.c.bf16 %v1532_v26, %v1531_v25 }
 0x3d3   :  { %v1549_v30 = vpack.c.bf16 %v1530_v28, %v1529_v27 }
 0x3d5   :  { %3468 = vmatprep.mubr.bf16.mxu1 %v1549_v30 }
 0x3d6   :  { %3469 = vmatmul.mubr.bf16.gmra.mrb[120].mxu1 %v1550_v29 }
 0x3db   :  { %v3426_v31 = vpop.f32.mrb[92].mxu1 }
 0x3dc   :  { %v1499_v32 = vadd.f32 %v3426_v31, %v4649_v52  ;;  %v1490_v33 = vpop.f32.mrb[93].mxu1 }
 0x3dd   :  { %v1491_v34 = vadd.f32 %v1490_v33, %v4649_v52  ;;  %v3427_v35 = vpop.f32.mrb[94].mxu1 }
 0x3de   :  { %v1502_v36 = vadd.f32 %v3427_v35, %v4649_v52  ;;  %v1493_v37 = vpop.f32.mrb[95].mxu1  ;;  %v1535_v39 = vmax.f32 %v1499_v32, 0.0 }
 0x3df   :  { %v1494_v38 = vadd.f32 %v1493_v37, %v4649_v52  ;;  %v1533_v41 = vmax.f32 %v1491_v34, 0.0  ;;  %v3909_v52 = vld [vmem:[%s5116_s6 + $0x10] sm:$0xff]  }
 0x3e0   :  { %v1536_v40 = vmax.f32 %v1502_v36, 0.0  ;;  %3528 = vmatprep.subr.bf16.mxu0 %v3909_v52 }
 0x3e1   :  { %v1534_v42 = vmax.f32 %v1494_v38, 0.0  ;;  %3529 = vmatpush3.bf16.msra.mxu0 %v3909_v52 }
 0x3e2   :  { %v1552_v43 = vpack.c.bf16 %v1536_v40, %v1535_v39  ;;  %3530 = vmatprep.subr.bf16.mxu0 %v3910_v56 }
 0x3e3   :  { %v1551_v44 = vpack.c.bf16 %v1534_v42, %v1533_v41 }
 0x3e5   :  { %3472 = vmatprep.mubr.bf16.mxu1 %v1551_v44  ;;  %3531 = vmatpush3.bf16.msra.mxu0 %v3910_v56 }
 0x3e6   :  { %3473 = vmatmul.mubr.bf16.gmra.mrb[124].mxu1 %v1552_v43  ;;  %3532 = vmatprep.subr.bf16.mxu0 %v3911_v62 }
 0x3e9   :  { %3533 = vmatpush3.bf16.msra.mxu0 %v3911_v62 }
 0x3ea   :  { %3534 = vmatprep.subr.bf16.mxu0 %v3912_v63 }
 0x3ed   :  { %3535 = vmatpush3.bf16.msra.mxu0 %v3912_v63 }
 0x449   :  { %v3446_v48 = vpop.f32.mrb[96].mxu1 }
 0x44a   :  { %v1661_v49 = vadd.f32 %v3446_v48, %v4710_v47  ;;  %v1652_v50 = vpop.f32.mrb[97].mxu1 }
 0x44b   :  { %v1653_v51 = vadd.f32 %v1652_v50, %v4710_v47  ;;  %v3447_v53 = vpop.f32.mrb[98].mxu1 }
 0x44c   :  { %v1664_v54 = vadd.f32 %v3447_v53, %v4710_v47  ;;  %v1655_v55 = vpop.f32.mrb[99].mxu1  ;;  %v1781_v57 = vmax.f32 %v1661_v49, 0.0 }
 0x44d   :  { %v1656_v58 = vadd.f32 %v1655_v55, %v4710_v47  ;;  %v1779_v60 = vmax.f32 %v1653_v51, 0.0 }
 0x44e   :  { %v1782_v59 = vmax.f32 %v1664_v54, 0.0 }
 0x44f   :  { %v1780_v61 = vmax.f32 %v1656_v58, 0.0 }
 0x450   :  { %v1812_v9 = vpack.c.bf16 %v1782_v59, %v1781_v57 }
 0x451   :  { %v1811_v10 = vpack.c.bf16 %v1780_v61, %v1779_v60 }
 0x453   :  { %3492 = vmatprep.mubr.bf16.mxu1 %v1811_v10 }
 0x454   :  { %3493 = vmatmul.mubr.bf16.vlgmr.msra.gmra.mrb[128].mxu1 %v1812_v9 }
 0x459   :  { %v3450_v0 = vpop.f32.mrb[100].mxu1 }
 0x45a   :  { %v1677_v1 = vadd.f32 %v3450_v0, %v4710_v47  ;;  %v1668_v2 = vpop.f32.mrb[101].mxu1 }
 0x45b   :  { %v1669_v3 = vadd.f32 %v1668_v2, %v4710_v47  ;;  %v3451_v4 = vpop.f32.mrb[102].mxu1 }
 0x45c   :  { %v1680_v6 = vadd.f32 %v3451_v4, %v4710_v47  ;;  %v1671_v7 = vpop.f32.mrb[103].mxu1  ;;  %v1785_v5 = vmax.f32 %v1677_v1, 0.0 }
 0x45d   :  { %v1672_v8 = vadd.f32 %v1671_v7, %v4710_v47  ;;  %v1783_v12 = vmax.f32 %v1669_v3, 0.0 }
 0x45e   :  { %v1786_v11 = vmax.f32 %v1680_v6, 0.0 }
 0x45f   :  { %v1784_v13 = vmax.f32 %v1672_v8, 0.0  ;;  %v3913_v8 = vld [vmem:[%s5116_s6 + $0x30] sm:$0xff]  }
 0x460   :  { %v1814_v14 = vpack.c.bf16 %v1786_v11, %v1785_v5  ;;  %3536 = vmatprep.subr.bf16.mxu0 %v3913_v8 }
 0x461   :  { %v1813_v15 = vpack.c.bf16 %v1784_v13, %v1783_v12  ;;  %3537 = vmatpush3.bf16.msra.mxu0 %v3913_v8 }
 0x463   :  { %3496 = vmatprep.mubr.bf16.mxu1 %v1813_v15 }
 0x464   :  { %3497 = vmatmul.mubr.bf16.gmra.mrb[132].mxu1 %v1814_v14 }
 0x469   :  { %v3454_v16 = vpop.f32.mrb[104].mxu1 }
 0x46a   :  { %v1693_v17 = vadd.f32 %v3454_v16, %v4710_v47  ;;  %v1684_v18 = vpop.f32.mrb[105].mxu1 }
 0x46b   :  { %v1685_v19 = vadd.f32 %v1684_v18, %v4710_v47  ;;  %v3455_v20 = vpop.f32.mrb[106].mxu1 }
 0x46c   :  { %v1696_v21 = vadd.f32 %v3455_v20, %v4710_v47  ;;  %v1687_v22 = vpop.f32.mrb[107].mxu1  ;;  %v1789_v24 = vmax.f32 %v1693_v17, 0.0  ;;  %v3914_v17 = vld [vmem:[%s5116_s6 + $0x38] sm:$0xff]  }
 0x46d   :  { %v1688_v23 = vadd.f32 %v1687_v22, %v4710_v47  ;;  %v1787_v26 = vmax.f32 %v1685_v19, 0.0  ;;  %3538 = vmatprep.subr.bf16.mxu0 %v3914_v17 }
 0x46e   :  { %v1790_v25 = vmax.f32 %v1696_v21, 0.0  ;;  %3539 = vmatpush3.bf16.msra.mxu0 %v3914_v17 }
 0x46f   :  { %v1788_v27 = vmax.f32 %v1688_v23, 0.0 }
 0x470   :  { %v1816_v28 = vpack.c.bf16 %v1790_v25, %v1789_v24 }
 0x471   :  { %v1815_v29 = vpack.c.bf16 %v1788_v27, %v1787_v26 }
 0x473   :  { %3500 = vmatprep.mubr.bf16.mxu1 %v1815_v29 }
 0x474   :  { %3501 = vmatmul.mubr.bf16.gmra.mrb[136].mxu1 %v1816_v28 }
 0x479   :  { %v3458_v30 = vpop.f32.mrb[108].mxu1 }
 0x47a   :  { %v1709_v31 = vadd.f32 %v3458_v30, %v4710_v47  ;;  %v1700_v32 = vpop.f32.mrb[109].mxu1 }
 0x47b   :  { %v1701_v33 = vadd.f32 %v1700_v32, %v4710_v47  ;;  %v3459_v34 = vpop.f32.mrb[110].mxu1 }
 0x47c   :  { %v1712_v35 = vadd.f32 %v3459_v34, %v4710_v47  ;;  %v1703_v36 = vpop.f32.mrb[111].mxu1  ;;  %v1793_v38 = vmax.f32 %v1709_v31, 0.0 }
 0x47d   :  { %v1704_v37 = vadd.f32 %v1703_v36, %v4710_v47  ;;  %v1791_v40 = vmax.f32 %v1701_v33, 0.0 }
 0x47e   :  { %v1794_v39 = vmax.f32 %v1712_v35, 0.0 }
 0x47f   :  { %v1792_v41 = vmax.f32 %v1704_v37, 0.0 }
 0x480   :  { %v1818_v42 = vpack.c.bf16 %v1794_v39, %v1793_v38  ;;  %v3915_v39 = vld [vmem:[%s5117_s7] sm:$0xff]  }
 0x481   :  { %v1817_v43 = vpack.c.bf16 %v1792_v41, %v1791_v40  ;;  %v3916_v40 = vld [vmem:[%s5117_s7 + $0x8] sm:$0xff]   ;;  %3572 = vmatprep.subr.bf16.mxu1 %v3915_v39  ;;  %v4768_v41 = vld [vmem:[#allocation2 + $0x4] ss:$0 sm:$0xff] }
 0x482   :  { %3573 = vmatpush3.bf16.msra.mxu1 %v3915_v39 }
 0x483   :  { %3504 = vmatprep.mubr.bf16.mxu1 %v1817_v43  ;;  %3574 = vmatprep.subr.bf16.mxu1 %v3916_v40 }
 0x484   :  { %3505 = vmatmul.mubr.bf16.gmra.mrb[140].mxu1 %v1818_v42 }
 0x486   :  { %3575 = vmatpush3.bf16.msra.mxu1 %v3916_v40 }
 0x489   :  { %v3462_v44 = vpop.f32.mrb[112].mxu1 }
 0x48a   :  { %v1725_v45 = vadd.f32 %v3462_v44, %v4710_v47  ;;  %v1716_v46 = vpop.f32.mrb[113].mxu1 }
 0x48b   :  { %v1717_v52 = vadd.f32 %v1716_v46, %v4710_v47  ;;  %v3463_v48 = vpop.f32.mrb[114].mxu1 }
 0x48c   :  { %v1728_v49 = vadd.f32 %v3463_v48, %v4710_v47  ;;  %v1719_v50 = vpop.f32.mrb[115].mxu1  ;;  %v1797_v53 = vmax.f32 %v1725_v45, 0.0 }
 0x48d   :  { %v1720_v51 = vadd.f32 %v1719_v50, %v4710_v47  ;;  %v1795_v55 = vmax.f32 %v1717_v52, 0.0 }
 0x48e   :  { %v1798_v54 = vmax.f32 %v1728_v49, 0.0  ;;  %v3918_v49 = vld [vmem:[%s5117_s7 + $0x18] sm:$0xff]  }
 0x48f   :  { %v1796_v56 = vmax.f32 %v1720_v51, 0.0 }
 0x490   :  { %v1820_v58 = vpack.c.bf16 %v1798_v54, %v1797_v53 }
 0x491   :  { %v1819_v57 = vpack.c.bf16 %v1796_v56, %v1795_v55 }
 0x493   :  { %3508 = vmatprep.mubr.bf16.mxu1 %v1819_v57 }
 0x494   :  { %3509 = vmatmul.mubr.bf16.gmra.mrb[144].mxu1 %v1820_v58  ;;  %v3919_v58 = vld [vmem:[%s5117_s7 + $0x20] sm:$0xff]  }
 0x499   :  { %v3466_v59 = vpop.f32.mrb[116].mxu1 }
 0x49a   :  { %v1741_v60 = vadd.f32 %v3466_v59, %v4710_v47  ;;  %v1732_v61 = vpop.f32.mrb[117].mxu1  ;;  %v3920_v59 = vld [vmem:[%s5117_s7 + $0x28] sm:$0xff]  }
 0x49b   :  { %v1733_v9 = vadd.f32 %v1732_v61, %v4710_v47  ;;  %v3467_v62 = vpop.f32.mrb[118].mxu1 }
 0x49c   :  { %v1744_v10 = vadd.f32 %v3467_v62, %v4710_v47  ;;  %v1735_v63 = vpop.f32.mrb[119].mxu1  ;;  %v1801_v1 = vmax.f32 %v1741_v60, 0.0 }
 0x49d   :  { %v1736_v0 = vadd.f32 %v1735_v63, %v4710_v47  ;;  %v1799_v3 = vmax.f32 %v1733_v9, 0.0 }
 0x49e   :  { %v1802_v2 = vmax.f32 %v1744_v10, 0.0 }
 0x49f   :  { %v1800_v4 = vmax.f32 %v1736_v0, 0.0 }
 0x4a0   :  { %v1822_v6 = vpack.c.bf16 %v1802_v2, %v1801_v1 }
 0x4a1   :  { %v1821_v7 = vpack.c.bf16 %v1800_v4, %v1799_v3 }
 0x4a3   :  { %3512 = vmatprep.mubr.bf16.mxu1 %v1821_v7 }
 0x4a4   :  { %3513 = vmatmul.mubr.bf16.gmra.mrb[148].mxu1 %v1822_v6 }
 0x4a9   :  { %v3470_v5 = vpop.f32.mrb[120].mxu1 }
 0x4aa   :  { %v1757_v11 = vadd.f32 %v3470_v5, %v4710_v47  ;;  %v1748_v12 = vpop.f32.mrb[121].mxu1 }
 0x4ab   :  { %v1749_v13 = vadd.f32 %v1748_v12, %v4710_v47  ;;  %v3471_v14 = vpop.f32.mrb[122].mxu1 }
 0x4ac   :  { %v1760_v15 = vadd.f32 %v3471_v14, %v4710_v47  ;;  %v1751_v16 = vpop.f32.mrb[123].mxu1  ;;  %v1805_v19 = vmax.f32 %v1757_v11, 0.0 }
 0x4ad   :  { %v1752_v18 = vadd.f32 %v1751_v16, %v4710_v47  ;;  %v1803_v21 = vmax.f32 %v1749_v13, 0.0 }
 0x4ae   :  { %v1806_v20 = vmax.f32 %v1760_v15, 0.0 }
 0x4af   :  { %v1804_v22 = vmax.f32 %v1752_v18, 0.0 }
 0x4b0   :  { %v1824_v23 = vpack.c.bf16 %v1806_v20, %v1805_v19 }
 0x4b1   :  { %v1823_v24 = vpack.c.bf16 %v1804_v22, %v1803_v21 }
 0x4b3   :  { %3516 = vmatprep.mubr.bf16.mxu1 %v1823_v24 }
 0x4b4   :  { %3517 = vmatmul.mubr.bf16.gmra.mrb[152].mxu1 %v1824_v23 }
 0x4b9   :  { %v3474_v25 = vpop.f32.mrb[124].mxu1 }
 0x4ba   :  { %v1773_v26 = vadd.f32 %v3474_v25, %v4710_v47  ;;  %v1764_v27 = vpop.f32.mrb[125].mxu1 }
 0x4bb   :  { %v1765_v28 = vadd.f32 %v1764_v27, %v4710_v47  ;;  %v3475_v29 = vpop.f32.mrb[126].mxu1 }
 0x4bc   :  { %v1776_v30 = vadd.f32 %v3475_v29, %v4710_v47  ;;  %v1767_v31 = vpop.f32.mrb[127].mxu1  ;;  %v1809_v33 = vmax.f32 %v1773_v26, 0.0 }
 0x4bd   :  { %v1768_v32 = vadd.f32 %v1767_v31, %v4710_v47  ;;  %v1807_v35 = vmax.f32 %v1765_v28, 0.0  ;;  %v3917_v47 = vld [vmem:[%s5117_s7 + $0x10] sm:$0xff]  }
 0x4be   :  { %v1810_v34 = vmax.f32 %v1776_v30, 0.0  ;;  %3576 = vmatprep.subr.bf16.mxu1 %v3917_v47 }
 0x4bf   :  { %v1808_v36 = vmax.f32 %v1768_v32, 0.0  ;;  %3577 = vmatpush3.bf16.msra.mxu1 %v3917_v47 }
 0x4c0   :  { %v1826_v37 = vpack.c.bf16 %v1810_v34, %v1809_v33  ;;  %3578 = vmatprep.subr.bf16.mxu1 %v3918_v49 }
 0x4c1   :  { %v1825_v38 = vpack.c.bf16 %v1808_v36, %v1807_v35 }
 0x4c3   :  { %3520 = vmatprep.mubr.bf16.mxu1 %v1825_v38  ;;  %3579 = vmatpush3.bf16.msra.mxu1 %v3918_v49 }
 0x4c4   :  { %3521 = vmatmul.mubr.bf16.gmra.mrb[156].mxu1 %v1826_v37  ;;  %3580 = vmatprep.subr.bf16.mxu1 %v3919_v58 }
 0x4c7   :  { %3581 = vmatpush3.bf16.msra.mxu1 %v3919_v58 }
 0x4c8   :  { %3582 = vmatprep.subr.bf16.mxu1 %v3920_v59 }
 0x4cb   :  { %3583 = vmatpush3.bf16.msra.mxu1 %v3920_v59 }
 0x527   :  { %v3494_v42 = vpop.f32.mrb[128].mxu1 }
 0x528   :  { %v1935_v43 = vadd.f32 %v3494_v42, %v4768_v41  ;;  %v1926_v44 = vpop.f32.mrb[129].mxu1 }
 0x529   :  { %v1927_v45 = vadd.f32 %v1926_v44, %v4768_v41  ;;  %v3495_v46 = vpop.f32.mrb[130].mxu1 }
 0x52a   :  { %v1938_v52 = vadd.f32 %v3495_v46, %v4768_v41  ;;  %v1929_v48 = vpop.f32.mrb[131].mxu1  ;;  %v2055_v51 = vmax.f32 %v1935_v43, 0.0 }
 0x52b   :  { %v1930_v50 = vadd.f32 %v1929_v48, %v4768_v41  ;;  %v2053_v54 = vmax.f32 %v1927_v45, 0.0 }
 0x52c   :  { %v2056_v53 = vmax.f32 %v1938_v52, 0.0 }
 0x52d   :  { %v2054_v55 = vmax.f32 %v1930_v50, 0.0 }
 0x52e   :  { %v2086_v56 = vpack.c.bf16 %v2056_v53, %v2055_v51 }
 0x52f   :  { %v2085_v57 = vpack.c.bf16 %v2054_v55, %v2053_v54 }
 0x531   :  { %3540 = vmatprep.mubr.bf16.mxu0 %v2085_v57 }
 0x532   :  { %3541 = vmatmul.mubr.bf16.vlgmr.msra.gmra.mrb[64].mxu0 %v2086_v56 }
 0x537   :  { %v3498_v60 = vpop.f32.mrb[132].mxu1 }
 0x538   :  { %v1951_v61 = vadd.f32 %v3498_v60, %v4768_v41  ;;  %v1942_v9 = vpop.f32.mrb[133].mxu1 }
 0x539   :  { %v1943_v62 = vadd.f32 %v1942_v9, %v4768_v41  ;;  %v3499_v10 = vpop.f32.mrb[134].mxu1 }
 0x53a   :  { %v1954_v63 = vadd.f32 %v3499_v10, %v4768_v41  ;;  %v1945_v0 = vpop.f32.mrb[135].mxu1  ;;  %v2059_v2 = vmax.f32 %v1951_v61, 0.0 }
 0x53b   :  { %v1946_v1 = vadd.f32 %v1945_v0, %v4768_v41  ;;  %v2057_v4 = vmax.f32 %v1943_v62, 0.0 }
 0x53c   :  { %v2060_v3 = vmax.f32 %v1954_v63, 0.0 }
 0x53d   :  { %v2058_v6 = vmax.f32 %v1946_v1, 0.0  ;;  %v3921_v1 = vld [vmem:[%s5117_s7 + $0x30] sm:$0xff]  }
 0x53e   :  { %v2088_v7 = vpack.c.bf16 %v2060_v3, %v2059_v2  ;;  %3584 = vmatprep.subr.bf16.mxu1 %v3921_v1 }
 0x53f   :  { %v2087_v8 = vpack.c.bf16 %v2058_v6, %v2057_v4  ;;  %3585 = vmatpush3.bf16.msra.mxu1 %v3921_v1 }
 0x541   :  { %3544 = vmatprep.mubr.bf16.mxu0 %v2087_v8 }
 0x542   :  { %3545 = vmatmul.mubr.bf16.gmra.mrb[68].mxu0 %v2088_v7 }
 0x547   :  { %v3502_v5 = vpop.f32.mrb[136].mxu1 }
 0x548   :  { %v1967_v11 = vadd.f32 %v3502_v5, %v4768_v41  ;;  %v1958_v12 = vpop.f32.mrb[137].mxu1 }
 0x549   :  { %v1959_v13 = vadd.f32 %v1958_v12, %v4768_v41  ;;  %v3503_v14 = vpop.f32.mrb[138].mxu1 }
 0x54a   :  { %v1970_v15 = vadd.f32 %v3503_v14, %v4768_v41  ;;  %v1961_v16 = vpop.f32.mrb[139].mxu1  ;;  %v2063_v18 = vmax.f32 %v1967_v11, 0.0  ;;  %v3922_v11 = vld [vmem:[%s5117_s7 + $0x38] sm:$0xff]  }
 0x54b   :  { %v1962_v17 = vadd.f32 %v1961_v16, %v4768_v41  ;;  %v2061_v20 = vmax.f32 %v1959_v13, 0.0  ;;  %3586 = vmatprep.subr.bf16.mxu1 %v3922_v11 }
 0x54c   :  { %v2064_v19 = vmax.f32 %v1970_v15, 0.0  ;;  %3587 = vmatpush3.bf16.msra.mxu1 %v3922_v11 }
 0x54d   :  { %v2062_v21 = vmax.f32 %v1962_v17, 0.0 }
 0x54e   :  { %v2090_v22 = vpack.c.bf16 %v2064_v19, %v2063_v18 }
 0x54f   :  { %v2089_v23 = vpack.c.bf16 %v2062_v21, %v2061_v20 }
 0x551   :  { %3548 = vmatprep.mubr.bf16.mxu0 %v2089_v23 }
 0x552   :  { %3549 = vmatmul.mubr.bf16.gmra.mrb[72].mxu0 %v2090_v22 }
 0x557   :  { %v3506_v24 = vpop.f32.mrb[140].mxu1 }
 0x558   :  { %v1983_v25 = vadd.f32 %v3506_v24, %v4768_v41  ;;  %v1974_v26 = vpop.f32.mrb[141].mxu1 }
 0x559   :  { %v1975_v27 = vadd.f32 %v1974_v26, %v4768_v41  ;;  %v3507_v28 = vpop.f32.mrb[142].mxu1 }
 0x55a   :  { %v1986_v29 = vadd.f32 %v3507_v28, %v4768_v41  ;;  %v1977_v30 = vpop.f32.mrb[143].mxu1  ;;  %v2067_v32 = vmax.f32 %v1983_v25, 0.0 }
 0x55b   :  { %v1978_v31 = vadd.f32 %v1977_v30, %v4768_v41  ;;  %v2065_v34 = vmax.f32 %v1975_v27, 0.0 }
 0x55c   :  { %v2068_v33 = vmax.f32 %v1986_v29, 0.0 }
 0x55d   :  { %v2066_v35 = vmax.f32 %v1978_v31, 0.0 }
 0x55e   :  { %v2092_v36 = vpack.c.bf16 %v2068_v33, %v2067_v32  ;;  %v3923_v33 = vld [vmem:[%s5118_s8] sm:$0xff]  }
 0x55f   :  { %v2091_v37 = vpack.c.bf16 %v2066_v35, %v2065_v34  ;;  %v3924_v34 = vld [vmem:[%s5118_s8 + $0x8] sm:$0xff]   ;;  %3620 = vmatprep.subr.bf16.mxu0 %v3923_v33  ;;  %3668 = vmatprep.subr.bf16.mxu1 %v3923_v33  ;;  %v4826_v35 = vld [vmem:[#allocation2 + $0x5] ss:$0 sm:$0xff] }
 0x560   :  { %3621 = vmatpush3.bf16.msra.mxu0 %v3923_v33 }
 0x561   :  { %3552 = vmatprep.mubr.bf16.mxu0 %v2091_v37  ;;  %3622 = vmatprep.subr.bf16.mxu0 %v3924_v34 }
 0x562   :  { %3553 = vmatmul.mubr.bf16.gmra.mrb[76].mxu0 %v2092_v36 }
 0x564   :  { %3623 = vmatpush3.bf16.msra.mxu0 %v3924_v34 }
 0x567   :  { %v3510_v38 = vpop.f32.mrb[144].mxu1 }
 0x568   :  { %v1999_v39 = vadd.f32 %v3510_v38, %v4768_v41  ;;  %v1990_v40 = vpop.f32.mrb[145].mxu1 }
 0x569   :  { %v1991_v47 = vadd.f32 %v1990_v40, %v4768_v41  ;;  %v3511_v42 = vpop.f32.mrb[146].mxu1 }
 0x56a   :  { %v2002_v43 = vadd.f32 %v3511_v42, %v4768_v41  ;;  %v1993_v44 = vpop.f32.mrb[147].mxu1  ;;  %v2071_v46 = vmax.f32 %v1999_v39, 0.0 }
 0x56b   :  { %v1994_v45 = vadd.f32 %v1993_v44, %v4768_v41  ;;  %v2069_v48 = vmax.f32 %v1991_v47, 0.0 }
 0x56c   :  { %v2072_v52 = vmax.f32 %v2002_v43, 0.0  ;;  %v3926_v43 = vld [vmem:[%s5118_s8 + $0x18] sm:$0xff]  }
 0x56d   :  { %v2070_v49 = vmax.f32 %v1994_v45, 0.0 }
 0x56e   :  { %v2094_v50 = vpack.c.bf16 %v2072_v52, %v2071_v46 }
 0x56f   :  { %v2093_v51 = vpack.c.bf16 %v2070_v49, %v2069_v48 }
 0x571   :  { %3556 = vmatprep.mubr.bf16.mxu0 %v2093_v51 }
 0x572   :  { %3557 = vmatmul.mubr.bf16.gmra.mrb[80].mxu0 %v2094_v50  ;;  %v3927_v50 = vld [vmem:[%s5118_s8 + $0x20] sm:$0xff]  }
 0x577   :  { %v3514_v53 = vpop.f32.mrb[148].mxu1 }
 0x578   :  { %v2015_v54 = vadd.f32 %v3514_v53, %v4768_v41  ;;  %v2006_v55 = vpop.f32.mrb[149].mxu1  ;;  %v3928_v53 = vld [vmem:[%s5118_s8 + $0x28] sm:$0xff]  }
 0x579   :  { %v2007_v56 = vadd.f32 %v2006_v55, %v4768_v41  ;;  %v3515_v58 = vpop.f32.mrb[150].mxu1 }
 0x57a   :  { %v2018_v57 = vadd.f32 %v3515_v58, %v4768_v41  ;;  %v2009_v59 = vpop.f32.mrb[151].mxu1  ;;  %v2075_v61 = vmax.f32 %v2015_v54, 0.0 }
 0x57b   :  { %v2010_v60 = vadd.f32 %v2009_v59, %v4768_v41  ;;  %v2073_v62 = vmax.f32 %v2007_v56, 0.0 }
 0x57c   :  { %v2076_v9 = vmax.f32 %v2018_v57, 0.0 }
 0x57d   :  { %v2074_v10 = vmax.f32 %v2010_v60, 0.0 }
 0x57e   :  { %v2096_v63 = vpack.c.bf16 %v2076_v9, %v2075_v61 }
 0x57f   :  { %v2095_v0 = vpack.c.bf16 %v2074_v10, %v2073_v62 }
 0x581   :  { %3560 = vmatprep.mubr.bf16.mxu0 %v2095_v0 }
 0x582   :  { %3561 = vmatmul.mubr.bf16.gmra.mrb[84].mxu0 %v2096_v63 }
 0x587   :  { %v3518_v2 = vpop.f32.mrb[152].mxu1 }
 0x588   :  { %v2031_v3 = vadd.f32 %v3518_v2, %v4768_v41  ;;  %v2022_v4 = vpop.f32.mrb[153].mxu1 }
 0x589   :  { %v2023_v6 = vadd.f32 %v2022_v4, %v4768_v41  ;;  %v3519_v7 = vpop.f32.mrb[154].mxu1 }
 0x58a   :  { %v2034_v8 = vadd.f32 %v3519_v7, %v4768_v41  ;;  %v2025_v5 = vpop.f32.mrb[155].mxu1  ;;  %v2079_v13 = vmax.f32 %v2031_v3, 0.0 }
 0x58b   :  { %v2026_v12 = vadd.f32 %v2025_v5, %v4768_v41  ;;  %v2077_v15 = vmax.f32 %v2023_v6, 0.0 }
 0x58c   :  { %v2080_v14 = vmax.f32 %v2034_v8, 0.0 }
 0x58d   :  { %v2078_v16 = vmax.f32 %v2026_v12, 0.0 }
 0x58e   :  { %v2098_v17 = vpack.c.bf16 %v2080_v14, %v2079_v13 }
 0x58f   :  { %v2097_v18 = vpack.c.bf16 %v2078_v16, %v2077_v15 }
 0x591   :  { %3564 = vmatprep.mubr.bf16.mxu0 %v2097_v18 }
 0x592   :  { %3565 = vmatmul.mubr.bf16.gmra.mrb[88].mxu0 %v2098_v17 }
 0x597   :  { %v3522_v19 = vpop.f32.mrb[156].mxu1 }
 0x598   :  { %v2047_v20 = vadd.f32 %v3522_v19, %v4768_v41  ;;  %v2038_v21 = vpop.f32.mrb[157].mxu1 }
 0x599   :  { %v2039_v22 = vadd.f32 %v2038_v21, %v4768_v41  ;;  %v3523_v23 = vpop.f32.mrb[158].mxu1 }
 0x59a   :  { %v2050_v24 = vadd.f32 %v3523_v23, %v4768_v41  ;;  %v2041_v25 = vpop.f32.mrb[159].mxu1  ;;  %v2083_v27 = vmax.f32 %v2047_v20, 0.0 }
 0x59b   :  { %v2042_v26 = vadd.f32 %v2041_v25, %v4768_v41  ;;  %v2081_v29 = vmax.f32 %v2039_v22, 0.0  ;;  %v3925_v41 = vld [vmem:[%s5118_s8 + $0x10] sm:$0xff]  }
 0x59c   :  { %v2084_v28 = vmax.f32 %v2050_v24, 0.0  ;;  %3624 = vmatprep.subr.bf16.mxu0 %v3925_v41 }
 0x59d   :  { %v2082_v30 = vmax.f32 %v2042_v26, 0.0  ;;  %3625 = vmatpush3.bf16.msra.mxu0 %v3925_v41 }
 0x59e   :  { %v2100_v31 = vpack.c.bf16 %v2084_v28, %v2083_v27  ;;  %3626 = vmatprep.subr.bf16.mxu0 %v3926_v43 }
 0x59f   :  { %v2099_v32 = vpack.c.bf16 %v2082_v30, %v2081_v29 }
 0x5a1   :  { %3568 = vmatprep.mubr.bf16.mxu0 %v2099_v32  ;;  %3627 = vmatpush3.bf16.msra.mxu0 %v3926_v43 }
 0x5a2   :  { %3569 = vmatmul.mubr.bf16.gmra.mrb[92].mxu0 %v2100_v31  ;;  %3628 = vmatprep.subr.bf16.mxu0 %v3927_v50 }
 0x5a5   :  { %3629 = vmatpush3.bf16.msra.mxu0 %v3927_v50 }
 0x5a6   :  { %3630 = vmatprep.subr.bf16.mxu0 %v3928_v53 }
 0x5a9   :  { %3631 = vmatpush3.bf16.msra.mxu0 %v3928_v53 }
 0x605   :  { %v3542_v36 = vpop.f32.mrb[64].mxu0 }
 0x606   :  { %v2209_v37 = vadd.f32 %v3542_v36, %v4826_v35  ;;  %v2200_v38 = vpop.f32.mrb[65].mxu0 }
 0x607   :  { %v2201_v39 = vadd.f32 %v2200_v38, %v4826_v35  ;;  %v3543_v40 = vpop.f32.mrb[66].mxu0 }
 0x608   :  { %v2212_v47 = vadd.f32 %v3543_v40, %v4826_v35  ;;  %v2203_v42 = vpop.f32.mrb[67].mxu0  ;;  %v2329_v45 = vmax.f32 %v2209_v37, 0.0 }
 0x609   :  { %v2204_v44 = vadd.f32 %v2203_v42, %v4826_v35  ;;  %v2327_v52 = vmax.f32 %v2201_v39, 0.0 }
 0x60a   :  { %v2330_v46 = vmax.f32 %v2212_v47, 0.0 }
 0x60b   :  { %v2328_v48 = vmax.f32 %v2204_v44, 0.0 }
 0x60c   :  { %v2360_v49 = vpack.c.bf16 %v2330_v46, %v2329_v45 }
 0x60d   :  { %v2359_v51 = vpack.c.bf16 %v2328_v48, %v2327_v52 }
 0x60f   :  { %3588 = vmatprep.mubr.bf16.mxu1 %v2359_v51 }
 0x610   :  { %3589 = vmatmul.mubr.bf16.vlgmr.msra.gmra.mrb[160].mxu1 %v2360_v49 }
 0x611   :  { %3676 = vmatpush3.bf16.msra.mxu1 %v3923_v33 }
 0x612   :  { %3669 = vmatprep.subr.bf16.mxu1 %v3924_v34 }
 0x615   :  { %v3546_v54 = vpop.f32.mrb[68].mxu0  ;;  %3677 = vmatpush3.bf16.msra.mxu1 %v3924_v34 }
 0x616   :  { %v2225_v55 = vadd.f32 %v3546_v54, %v4826_v35  ;;  %v2216_v56 = vpop.f32.mrb[69].mxu0  ;;  %3670 = vmatprep.subr.bf16.mxu1 %v3925_v41 }
 0x617   :  { %v2217_v58 = vadd.f32 %v2216_v56, %v4826_v35  ;;  %v3547_v57 = vpop.f32.mrb[70].mxu0 }
 0x618   :  { %v2228_v59 = vadd.f32 %v3547_v57, %v4826_v35  ;;  %v2219_v60 = vpop.f32.mrb[71].mxu0  ;;  %v2333_v9 = vmax.f32 %v2225_v55, 0.0 }
 0x619   :  { %v2220_v61 = vadd.f32 %v2219_v60, %v4826_v35  ;;  %3678 = vmatpush3.bf16.msra.mxu1 %v3925_v41  ;;  %v2331_v10 = vmax.f32 %v2217_v58, 0.0 }
 0x61a   :  { %v2334_v62 = vmax.f32 %v2228_v59, 0.0  ;;  %3671 = vmatprep.subr.bf16.mxu1 %v3926_v43 }
 0x61b   :  { %v2332_v63 = vmax.f32 %v2220_v61, 0.0  ;;  %v3929_v61 = vld [vmem:[%s5118_s8 + $0x30] sm:$0xff]  }
 0x61c   :  { %v2362_v0 = vpack.c.bf16 %v2334_v62, %v2333_v9  ;;  %3632 = vmatprep.subr.bf16.mxu0 %v3929_v61 }
 0x61d   :  { %v2361_v1 = vpack.c.bf16 %v2332_v63, %v2331_v10  ;;  %3679 = vmatpush3.bf16.msra.mxu1 %v3926_v43  ;;  %3633 = vmatpush3.bf16.msra.mxu0 %v3929_v61 }
 0x61e   :  { %3672 = vmatprep.subr.bf16.mxu1 %v3927_v50 }
 0x61f   :  { %3592 = vmatprep.mubr.bf16.mxu1 %v2361_v1 }
 0x620   :  { %3593 = vmatmul.mubr.bf16.gmra.mrb[164].mxu1 %v2362_v0 }
 0x621   :  { %3680 = vmatpush3.bf16.msra.mxu1 %v3927_v50 }
 0x622   :  { %3673 = vmatprep.subr.bf16.mxu1 %v3928_v53 }
 0x625   :  { %v3550_v2 = vpop.f32.mrb[72].mxu0  ;;  %3681 = vmatpush3.bf16.msra.mxu1 %v3928_v53 }
 0x626   :  { %v2241_v3 = vadd.f32 %v3550_v2, %v4826_v35  ;;  %v2232_v4 = vpop.f32.mrb[73].mxu0  ;;  %3674 = vmatprep.subr.bf16.mxu1 %v3929_v61 }
 0x627   :  { %v2233_v6 = vadd.f32 %v2232_v4, %v4826_v35  ;;  %v3551_v7 = vpop.f32.mrb[74].mxu0 }
 0x628   :  { %v2244_v8 = vadd.f32 %v3551_v7, %v4826_v35  ;;  %v2235_v5 = vpop.f32.mrb[75].mxu0  ;;  %v2337_v12 = vmax.f32 %v2241_v3, 0.0  ;;  %v3930_v3 = vld [vmem:[%s5118_s8 + $0x38] sm:$0xff]  }
 0x629   :  { %v2236_v11 = vadd.f32 %v2235_v5, %v4826_v35  ;;  %v2335_v14 = vmax.f32 %v2233_v6, 0.0  ;;  %3682 = vmatpush3.bf16.msra.mxu1 %v3929_v61  ;;  %3634 = vmatprep.subr.bf16.mxu0 %v3930_v3 }
 0x62a   :  { %v2338_v13 = vmax.f32 %v2244_v8, 0.0  ;;  %3675 = vmatprep.subr.bf16.mxu1 %v3930_v3  ;;  %3635 = vmatpush3.bf16.msra.mxu0 %v3930_v3 }
 0x62b   :  { %v2336_v15 = vmax.f32 %v2236_v11, 0.0 }
 0x62c   :  { %v2364_v16 = vpack.c.bf16 %v2338_v13, %v2337_v12 }
 0x62d   :  { %v2363_v17 = vpack.c.bf16 %v2336_v15, %v2335_v14  ;;  %3683 = vmatpush3.bf16.msra.mxu1 %v3930_v3 }
 0x62f   :  { %3596 = vmatprep.mubr.bf16.mxu1 %v2363_v17 }
 0x630   :  { %3597 = vmatmul.mubr.bf16.gmra.mrb[168].mxu1 %v2364_v16 }
 0x635   :  { %v3554_v18 = vpop.f32.mrb[76].mxu0 }
 0x636   :  { %v2257_v19 = vadd.f32 %v3554_v18, %v4826_v35  ;;  %v2248_v20 = vpop.f32.mrb[77].mxu0 }
 0x637   :  { %v2249_v21 = vadd.f32 %v2248_v20, %v4826_v35  ;;  %v3555_v22 = vpop.f32.mrb[78].mxu0 }
 0x638   :  { %v2260_v23 = vadd.f32 %v3555_v22, %v4826_v35  ;;  %v2251_v24 = vpop.f32.mrb[79].mxu0  ;;  %v2341_v26 = vmax.f32 %v2257_v19, 0.0 }
 0x639   :  { %v2252_v25 = vadd.f32 %v2251_v24, %v4826_v35  ;;  %v2339_v28 = vmax.f32 %v2249_v21, 0.0 }
 0x63a   :  { %v2342_v27 = vmax.f32 %v2260_v23, 0.0 }
 0x63b   :  { %v2340_v29 = vmax.f32 %v2252_v25, 0.0 }
 0x63c   :  { %v2366_v30 = vpack.c.bf16 %v2342_v27, %v2341_v26  ;;  %v4878_v27 = vld [vmem:[#allocation2 + $0x6] ss:$0 sm:$0xff] }
 0x63d   :  { %v2365_v31 = vpack.c.bf16 %v2340_v29, %v2339_v28 }
 0x63f   :  { %3600 = vmatprep.mubr.bf16.mxu1 %v2365_v31 }
 0x640   :  { %3601 = vmatmul.mubr.bf16.gmra.mrb[172].mxu1 %v2366_v30 }
 0x645   :  { %v3558_v32 = vpop.f32.mrb[80].mxu0 }
 0x646   :  { %v2273_v33 = vadd.f32 %v3558_v32, %v4826_v35  ;;  %v2264_v34 = vpop.f32.mrb[81].mxu0 }
 0x647   :  { %v2265_v41 = vadd.f32 %v2264_v34, %v4826_v35  ;;  %v3559_v36 = vpop.f32.mrb[82].mxu0 }
 0x648   :  { %v2276_v37 = vadd.f32 %v3559_v36, %v4826_v35  ;;  %v2267_v38 = vpop.f32.mrb[83].mxu0  ;;  %v2345_v40 = vmax.f32 %v2273_v33, 0.0 }
 0x649   :  { %v2268_v39 = vadd.f32 %v2267_v38, %v4826_v35  ;;  %v2343_v42 = vmax.f32 %v2265_v41, 0.0 }
 0x64a   :  { %v2346_v47 = vmax.f32 %v2276_v37, 0.0 }
 0x64b   :  { %v2344_v43 = vmax.f32 %v2268_v39, 0.0 }
 0x64c   :  { %v2368_v44 = vpack.c.bf16 %v2346_v47, %v2345_v40 }
 0x64d   :  { %v2367_v45 = vpack.c.bf16 %v2344_v43, %v2343_v42 }
 0x64f   :  { %3604 = vmatprep.mubr.bf16.mxu1 %v2367_v45 }
 0x650   :  { %3605 = vmatmul.mubr.bf16.gmra.mrb[176].mxu1 %v2368_v44 }
 0x655   :  { %v3562_v46 = vpop.f32.mrb[84].mxu0 }
 0x656   :  { %v2289_v52 = vadd.f32 %v3562_v46, %v4826_v35  ;;  %v2280_v48 = vpop.f32.mrb[85].mxu0 }
 0x657   :  { %v2281_v49 = vadd.f32 %v2280_v48, %v4826_v35  ;;  %v3563_v50 = vpop.f32.mrb[86].mxu0 }
 0x658   :  { %v2292_v51 = vadd.f32 %v3563_v50, %v4826_v35  ;;  %v2283_v53 = vpop.f32.mrb[87].mxu0  ;;  %v2349_v55 = vmax.f32 %v2289_v52, 0.0 }
 0x659   :  { %v2284_v54 = vadd.f32 %v2283_v53, %v4826_v35  ;;  %v2347_v58 = vmax.f32 %v2281_v49, 0.0 }
 0x65a   :  { %v2350_v56 = vmax.f32 %v2292_v51, 0.0 }
 0x65b   :  { %v2348_v57 = vmax.f32 %v2284_v54, 0.0 }
 0x65c   :  { %v2370_v59 = vpack.c.bf16 %v2350_v56, %v2349_v55 }
 0x65d   :  { %v2369_v60 = vpack.c.bf16 %v2348_v57, %v2347_v58 }
 0x65f   :  { %3608 = vmatprep.mubr.bf16.mxu1 %v2369_v60 }
 0x660   :  { %3609 = vmatmul.mubr.bf16.gmra.mrb[180].mxu1 %v2370_v59 }
 0x665   :  { %v3566_v9 = vpop.f32.mrb[88].mxu0 }
 0x666   :  { %v2305_v62 = vadd.f32 %v3566_v9, %v4826_v35  ;;  %v2296_v10 = vpop.f32.mrb[89].mxu0 }
 0x667   :  { %v2297_v63 = vadd.f32 %v2296_v10, %v4826_v35  ;;  %v3567_v0 = vpop.f32.mrb[90].mxu0 }
 0x668   :  { %v2308_v1 = vadd.f32 %v3567_v0, %v4826_v35  ;;  %v2299_v2 = vpop.f32.mrb[91].mxu0  ;;  %v2353_v6 = vmax.f32 %v2305_v62, 0.0 }
 0x669   :  { %v2300_v4 = vadd.f32 %v2299_v2, %v4826_v35  ;;  %v2351_v8 = vmax.f32 %v2297_v63, 0.0 }
 0x66a   :  { %v2354_v7 = vmax.f32 %v2308_v1, 0.0 }
 0x66b   :  { %v2352_v5 = vmax.f32 %v2300_v4, 0.0 }
 0x66c   :  { %v2372_v11 = vpack.c.bf16 %v2354_v7, %v2353_v6 }
 0x66d   :  { %v2371_v12 = vpack.c.bf16 %v2352_v5, %v2351_v8 }
 0x66f   :  { %3612 = vmatprep.mubr.bf16.mxu1 %v2371_v12 }
 0x670   :  { %3613 = vmatmul.mubr.bf16.gmra.mrb[184].mxu1 %v2372_v11 }
 0x675   :  { %v3570_v13 = vpop.f32.mrb[92].mxu0 }
 0x676   :  { %v2321_v14 = vadd.f32 %v3570_v13, %v4826_v35  ;;  %v2312_v15 = vpop.f32.mrb[93].mxu0 }
 0x677   :  { %v2313_v16 = vadd.f32 %v2312_v15, %v4826_v35  ;;  %v3571_v17 = vpop.f32.mrb[94].mxu0 }
 0x678   :  { %v2324_v18 = vadd.f32 %v3571_v17, %v4826_v35  ;;  %v2315_v19 = vpop.f32.mrb[95].mxu0  ;;  %v2357_v21 = vmax.f32 %v2321_v14, 0.0 }
 0x679   :  { %v2316_v20 = vadd.f32 %v2315_v19, %v4826_v35  ;;  %v2355_v23 = vmax.f32 %v2313_v16, 0.0 }
 0x67a   :  { %v2358_v22 = vmax.f32 %v2324_v18, 0.0 }
 0x67b   :  { %v2356_v24 = vmax.f32 %v2316_v20, 0.0 }
 0x67c   :  { %v2374_v25 = vpack.c.bf16 %v2358_v22, %v2357_v21 }
 0x67d   :  { %v2373_v26 = vpack.c.bf16 %v2356_v24, %v2355_v23 }
 0x67f   :  { %3616 = vmatprep.mubr.bf16.mxu1 %v2373_v26 }
 0x680   :  { %3617 = vmatmul.mubr.bf16.gmra.mrb[188].mxu1 %v2374_v25 }
 0x6e3   :  { %v3590_v28 = vpop.f32.mrb[160].mxu1 }
 0x6e4   :  { %v2483_v29 = vadd.f32 %v3590_v28, %v4878_v27  ;;  %v2474_v30 = vpop.f32.mrb[161].mxu1 }
 0x6e5   :  { %v2475_v31 = vadd.f32 %v2474_v30, %v4878_v27  ;;  %v3591_v32 = vpop.f32.mrb[162].mxu1 }
 0x6e6   :  { %v2486_v33 = vadd.f32 %v3591_v32, %v4878_v27  ;;  %v2477_v35 = vpop.f32.mrb[163].mxu1  ;;  %v2603_v41 = vmax.f32 %v2483_v29, 0.0 }
 0x6e7   :  { %v2478_v34 = vadd.f32 %v2477_v35, %v4878_v27  ;;  %v2601_v37 = vmax.f32 %v2475_v31, 0.0 }
 0x6e8   :  { %v2604_v36 = vmax.f32 %v2486_v33, 0.0 }
 0x6e9   :  { %v2602_v38 = vmax.f32 %v2478_v34, 0.0 }
 0x6ea   :  { %v2634_v39 = vpack.c.bf16 %v2604_v36, %v2603_v41 }
 0x6eb   :  { %v2633_v40 = vpack.c.bf16 %v2602_v38, %v2601_v37 }
 0x6ed   :  { %3636 = vmatprep.mubr.bf16.mxu0 %v2633_v40 }
 0x6ee   :  { %3637 = vmatmul.mubr.bf16.vlgmr.msra.gmra.mrb[96].mxu0 %v2634_v39 }
 0x6f3   :  { %v3594_v47 = vpop.f32.mrb[164].mxu1 }
 0x6f4   :  { %v2499_v42 = vadd.f32 %v3594_v47, %v4878_v27  ;;  %v2490_v43 = vpop.f32.mrb[165].mxu1 }
 0x6f5   :  { %v2491_v44 = vadd.f32 %v2490_v43, %v4878_v27  ;;  %v3595_v45 = vpop.f32.mrb[166].mxu1 }
 0x6f6   :  { %v2502_v46 = vadd.f32 %v3595_v45, %v4878_v27  ;;  %v2493_v52 = vpop.f32.mrb[167].mxu1  ;;  %v2607_v49 = vmax.f32 %v2499_v42, 0.0 }
 0x6f7   :  { %v2494_v48 = vadd.f32 %v2493_v52, %v4878_v27  ;;  %v2605_v51 = vmax.f32 %v2491_v44, 0.0 }
 0x6f8   :  { %v2608_v50 = vmax.f32 %v2502_v46, 0.0 }
 0x6f9   :  { %v2606_v53 = vmax.f32 %v2494_v48, 0.0 }
 0x6fa   :  { %v2636_v54 = vpack.c.bf16 %v2608_v50, %v2607_v49 }
 0x6fb   :  { %v2635_v55 = vpack.c.bf16 %v2606_v53, %v2605_v51 }
 0x6fd   :  { %3640 = vmatprep.mubr.bf16.mxu0 %v2635_v55 }
 0x6fe   :  { %3641 = vmatmul.mubr.bf16.gmra.mrb[100].mxu0 %v2636_v54 }
 0x703   :  { %v3598_v56 = vpop.f32.mrb[168].mxu1 }
 0x704   :  { %v2515_v58 = vadd.f32 %v3598_v56, %v4878_v27  ;;  %v2506_v57 = vpop.f32.mrb[169].mxu1 }
 0x705   :  { %v2507_v59 = vadd.f32 %v2506_v57, %v4878_v27  ;;  %v3599_v60 = vpop.f32.mrb[170].mxu1 }
 0x706   :  { %v2518_v61 = vadd.f32 %v3599_v60, %v4878_v27  ;;  %v2509_v9 = vpop.f32.mrb[171].mxu1  ;;  %v2611_v10 = vmax.f32 %v2515_v58, 0.0 }
 0x707   :  { %v2510_v62 = vadd.f32 %v2509_v9, %v4878_v27  ;;  %v2609_v0 = vmax.f32 %v2507_v59, 0.0 }
 0x708   :  { %v2612_v63 = vmax.f32 %v2518_v61, 0.0 }
 0x709   :  { %v2610_v1 = vmax.f32 %v2510_v62, 0.0 }
 0x70a   :  { %v2638_v2 = vpack.c.bf16 %v2612_v63, %v2611_v10 }
 0x70b   :  { %v2637_v3 = vpack.c.bf16 %v2610_v1, %v2609_v0 }
 0x70d   :  { %3644 = vmatprep.mubr.bf16.mxu0 %v2637_v3 }
 0x70e   :  { %3645 = vmatmul.mubr.bf16.gmra.mrb[104].mxu0 %v2638_v2 }
 0x713   :  { %v3602_v4 = vpop.f32.mrb[172].mxu1 }
 0x714   :  { %v2531_v6 = vadd.f32 %v3602_v4, %v4878_v27  ;;  %v2522_v7 = vpop.f32.mrb[173].mxu1 }
 0x715   :  { %v2523_v8 = vadd.f32 %v2522_v7, %v4878_v27  ;;  %v3603_v5 = vpop.f32.mrb[174].mxu1 }
 0x716   :  { %v2534_v11 = vadd.f32 %v3603_v5, %v4878_v27  ;;  %v2525_v12 = vpop.f32.mrb[175].mxu1  ;;  %v2615_v14 = vmax.f32 %v2531_v6, 0.0 }
 0x717   :  { %v2526_v13 = vadd.f32 %v2525_v12, %v4878_v27  ;;  %v2613_v16 = vmax.f32 %v2523_v8, 0.0 }
 0x718   :  { %v2616_v15 = vmax.f32 %v2534_v11, 0.0 }
 0x719   :  { %v2614_v17 = vmax.f32 %v2526_v13, 0.0  ;;  %v4912_v13 = vld [vmem:[#allocation2 + $0x7] ss:$0 sm:$0xff] }
 0x71a   :  { %v2640_v18 = vpack.c.bf16 %v2616_v15, %v2615_v14 }
 0x71b   :  { %v2639_v19 = vpack.c.bf16 %v2614_v17, %v2613_v16  ;;  %v4915_v17 = vld [vmem:[#allocation2 + $0x10] ss:$0 sm:$0xff] }
 0x71d   :  { %3648 = vmatprep.mubr.bf16.mxu0 %v2639_v19 }
 0x71e   :  { %3649 = vmatmul.mubr.bf16.gmra.mrb[108].mxu0 %v2640_v18 }
 0x723   :  { %v3606_v20 = vpop.f32.mrb[176].mxu1 }
 0x724   :  { %v2547_v21 = vadd.f32 %v3606_v20, %v4878_v27  ;;  %v2538_v22 = vpop.f32.mrb[177].mxu1 }
 0x725   :  { %v2539_v23 = vadd.f32 %v2538_v22, %v4878_v27  ;;  %v3607_v24 = vpop.f32.mrb[178].mxu1  ;;  %v4919_v22 = vld [vmem:[#allocation2 + $0x11] ss:$0 sm:$0xff] }
 0x726   :  { %v2550_v25 = vadd.f32 %v3607_v24, %v4878_v27  ;;  %v2541_v26 = vpop.f32.mrb[179].mxu1  ;;  %v2619_v29 = vmax.f32 %v2547_v21, 0.0 }
 0x727   :  { %v2542_v28 = vadd.f32 %v2541_v26, %v4878_v27  ;;  %v2617_v31 = vmax.f32 %v2539_v23, 0.0 }
 0x728   :  { %v2620_v30 = vmax.f32 %v2550_v25, 0.0 }
 0x729   :  { %v2618_v32 = vmax.f32 %v2542_v28, 0.0 }
 0x72a   :  { %v2642_v33 = vpack.c.bf16 %v2620_v30, %v2619_v29 }
 0x72b   :  { %v2641_v35 = vpack.c.bf16 %v2618_v32, %v2617_v31 }
 0x72d   :  { %3652 = vmatprep.mubr.bf16.mxu0 %v2641_v35 }
 0x72e   :  { %3653 = vmatmul.mubr.bf16.gmra.mrb[112].mxu0 %v2642_v33 }
 0x733   :  { %v3610_v34 = vpop.f32.mrb[180].mxu1 }
 0x734   :  { %v2563_v41 = vadd.f32 %v3610_v34, %v4878_v27  ;;  %v2554_v36 = vpop.f32.mrb[181].mxu1 }
 0x735   :  { %v2555_v37 = vadd.f32 %v2554_v36, %v4878_v27  ;;  %v3611_v38 = vpop.f32.mrb[182].mxu1 }
 0x736   :  { %v2566_v39 = vadd.f32 %v3611_v38, %v4878_v27  ;;  %v2557_v40 = vpop.f32.mrb[183].mxu1  ;;  %v2623_v42 = vmax.f32 %v2563_v41, 0.0 }
 0x737   :  { %v2558_v47 = vadd.f32 %v2557_v40, %v4878_v27  ;;  %v2621_v44 = vmax.f32 %v2555_v37, 0.0 }
 0x738   :  { %v2624_v43 = vmax.f32 %v2566_v39, 0.0 }
 0x739   :  { %v2622_v45 = vmax.f32 %v2558_v47, 0.0 }
 0x73a   :  { %v2644_v46 = vpack.c.bf16 %v2624_v43, %v2623_v42 }
 0x73b   :  { %v2643_v52 = vpack.c.bf16 %v2622_v45, %v2621_v44 }
 0x73d   :  { %3656 = vmatprep.mubr.bf16.mxu0 %v2643_v52 }
 0x73e   :  { %3657 = vmatmul.mubr.bf16.gmra.mrb[116].mxu0 %v2644_v46 }
 0x743   :  { %v3614_v48 = vpop.f32.mrb[184].mxu1 }
 0x744   :  { %v2579_v49 = vadd.f32 %v3614_v48, %v4878_v27  ;;  %v2570_v50 = vpop.f32.mrb[185].mxu1 }
 0x745   :  { %v2571_v51 = vadd.f32 %v2570_v50, %v4878_v27  ;;  %v3615_v53 = vpop.f32.mrb[186].mxu1 }
 0x746   :  { %v2582_v54 = vadd.f32 %v3615_v53, %v4878_v27  ;;  %v2573_v55 = vpop.f32.mrb[187].mxu1  ;;  %v2627_v58 = vmax.f32 %v2579_v49, 0.0 }
 0x747   :  { %v2574_v56 = vadd.f32 %v2573_v55, %v4878_v27  ;;  %v2625_v59 = vmax.f32 %v2571_v51, 0.0 }
 0x748   :  { %v2628_v57 = vmax.f32 %v2582_v54, 0.0 }
 0x749   :  { %v2626_v60 = vmax.f32 %v2574_v56, 0.0 }
 0x74a   :  { %v2646_v61 = vpack.c.bf16 %v2628_v57, %v2627_v58 }
 0x74b   :  { %v2645_v9 = vpack.c.bf16 %v2626_v60, %v2625_v59 }
 0x74d   :  { %3660 = vmatprep.mubr.bf16.mxu1 %v2645_v9 }
 0x74e   :  { %3661 = vmatmul.mubr.bf16.vlgmr.msra.gmra.mrb[192].mxu1 %v2646_v61 }
 0x753   :  { %v3618_v62 = vpop.f32.mrb[188].mxu1 }
 0x754   :  { %v2595_v10 = vadd.f32 %v3618_v62, %v4878_v27  ;;  %v2586_v63 = vpop.f32.mrb[189].mxu1 }
 0x755   :  { %v2587_v0 = vadd.f32 %v2586_v63, %v4878_v27  ;;  %v3619_v1 = vpop.f32.mrb[190].mxu1 }
 0x756   :  { %v2598_v2 = vadd.f32 %v3619_v1, %v4878_v27  ;;  %v2589_v3 = vpop.f32.mrb[191].mxu1  ;;  %v2631_v6 = vmax.f32 %v2595_v10, 0.0 }
 0x757   :  { %v2590_v4 = vadd.f32 %v2589_v3, %v4878_v27  ;;  %v2629_v8 = vmax.f32 %v2587_v0, 0.0 }
 0x758   :  { %v2632_v7 = vmax.f32 %v2598_v2, 0.0 }
 0x759   :  { %v2630_v5 = vmax.f32 %v2590_v4, 0.0 }
 0x75a   :  { %v2648_v11 = vpack.c.bf16 %v2632_v7, %v2631_v6 }
 0x75b   :  { %v2647_v12 = vpack.c.bf16 %v2630_v5, %v2629_v8 }
 0x75d   :  { %3664 = vmatprep.mubr.bf16.mxu1 %v2647_v12 }
 0x75e   :  { %3665 = vmatmul.mubr.bf16.gmra.mrb[196].mxu1 %v2648_v11 }
 0x7c1   :  { %v3638_v14 = vpop.f32.mrb[96].mxu0 }
 0x7c2   :  { %v2757_v15 = vadd.f32 %v3638_v14, %v4912_v13  ;;  %v2748_v16 = vpop.f32.mrb[97].mxu0 }
 0x7c3   :  { %v2749_v18 = vadd.f32 %v2748_v16, %v4912_v13  ;;  %v3639_v19 = vpop.f32.mrb[98].mxu0 }
 0x7c4   :  { %v2877_v27 = vmax.f32 %v2757_v15, 0.0  ;;  %v2760_v20 = vadd.f32 %v3639_v19, %v4912_v13  ;;  %v2751_v21 = vpop.f32.mrb[99].mxu0 }
 0x7c5   :  { %v2875_v23 = vmax.f32 %v2749_v18, 0.0  ;;  %v2752_v24 = vadd.f32 %v2751_v21, %v4912_v13 }
 0x7c6   :  { %v2910_v25 = vmul.f32 %v4915_v17, %v2877_v27  ;;  %v2878_v26 = vmax.f32 %v2760_v20, 0.0 }
 0x7c7   :  { %v2908_v28 = vmul.f32 %v4915_v17, %v2875_v23  ;;  %v2876_v29 = vmax.f32 %v2752_v24, 0.0 }
 0x7c8   :  { %v2943_v30 = vadd.f32 %v4919_v22, %v2910_v25  ;;  %v2911_v31 = vmul.f32 %v4915_v17, %v2878_v26 }
 0x7c9   :  { %v2941_v32 = vadd.f32 %v4919_v22, %v2908_v28  ;;  %v2909_v33 = vmul.f32 %v4915_v17, %v2876_v29 }
 0x7ca   :  { %2975 = vst [vmem:[%s5120_s10 + $0x10] sm:$0xff] %v2943_v30  ;;  %v2944_v35 = vadd.f32 %v4919_v22, %v2911_v31 }
 0x7cb   :  { %2973 = vst [vmem:[%s5120_s10] sm:$0xff] %v2941_v32  ;;  %v2942_v34 = vadd.f32 %v4919_v22, %v2909_v33 }
 0x7cc   :  { %2976 = vst [vmem:[%s5120_s10 + $0x18] sm:$0xff] %v2944_v35 }
 0x7cd   :  { %2974 = vst [vmem:[%s5120_s10 + $0x8] sm:$0xff] %v2942_v34 }
 0x7d1   :  { %v3642_v41 = vpop.f32.mrb[100].mxu0 }
 0x7d2   :  { %v2773_v36 = vadd.f32 %v3642_v41, %v4912_v13  ;;  %v2764_v37 = vpop.f32.mrb[101].mxu0 }
 0x7d3   :  { %v2765_v38 = vadd.f32 %v2764_v37, %v4912_v13  ;;  %v3643_v39 = vpop.f32.mrb[102].mxu0 }
 0x7d4   :  { %v2881_v40 = vmax.f32 %v2773_v36, 0.0  ;;  %v2776_v47 = vadd.f32 %v3643_v39, %v4912_v13  ;;  %v2767_v42 = vpop.f32.mrb[103].mxu0 }
 0x7d5   :  { %v2879_v43 = vmax.f32 %v2765_v38, 0.0  ;;  %v2768_v44 = vadd.f32 %v2767_v42, %v4912_v13 }
 0x7d6   :  { %v2914_v45 = vmul.f32 %v4915_v17, %v2881_v40  ;;  %v2882_v46 = vmax.f32 %v2776_v47, 0.0 }
 0x7d7   :  { %v2912_v52 = vmul.f32 %v4915_v17, %v2879_v43  ;;  %v2880_v48 = vmax.f32 %v2768_v44, 0.0 }
 0x7d8   :  { %v2947_v49 = vadd.f32 %v4919_v22, %v2914_v45  ;;  %v2915_v50 = vmul.f32 %v4915_v17, %v2882_v46 }
 0x7d9   :  { %v2945_v51 = vadd.f32 %v4919_v22, %v2912_v52  ;;  %v2913_v53 = vmul.f32 %v4915_v17, %v2880_v48 }
 0x7da   :  { %2979 = vst [vmem:[%s5120_s10 + $0x30] sm:$0xff] %v2947_v49  ;;  %v2948_v54 = vadd.f32 %v4919_v22, %v2915_v50 }
 0x7db   :  { %2977 = vst [vmem:[%s5120_s10 + $0x20] sm:$0xff] %v2945_v51  ;;  %v2946_v55 = vadd.f32 %v4919_v22, %v2913_v53 }
 0x7dc   :  { %2980 = vst [vmem:[%s5120_s10 + $0x38] sm:$0xff] %v2948_v54 }
 0x7dd   :  { %2978 = vst [vmem:[%s5120_s10 + $0x28] sm:$0xff] %v2946_v55 }
 0x7e1   :  { %v3646_v56 = vpop.f32.mrb[104].mxu0 }
 0x7e2   :  { %v2789_v58 = vadd.f32 %v3646_v56, %v4912_v13  ;;  %v2780_v57 = vpop.f32.mrb[105].mxu0 }
 0x7e3   :  { %v2781_v59 = vadd.f32 %v2780_v57, %v4912_v13  ;;  %v3647_v60 = vpop.f32.mrb[106].mxu0 }
 0x7e4   :  { %v2885_v61 = vmax.f32 %v2789_v58, 0.0  ;;  %v2792_v9 = vadd.f32 %v3647_v60, %v4912_v13  ;;  %v2783_v62 = vpop.f32.mrb[107].mxu0 }
 0x7e5   :  { %v2883_v10 = vmax.f32 %v2781_v59, 0.0  ;;  %v2784_v63 = vadd.f32 %v2783_v62, %v4912_v13 }
 0x7e6   :  { %v2918_v0 = vmul.f32 %v4915_v17, %v2885_v61  ;;  %v2886_v1 = vmax.f32 %v2792_v9, 0.0 }
 0x7e7   :  { %v2916_v2 = vmul.f32 %v4915_v17, %v2883_v10  ;;  %v2884_v3 = vmax.f32 %v2784_v63, 0.0 }
 0x7e8   :  { %v2951_v4 = vadd.f32 %v4919_v22, %v2918_v0  ;;  %v2919_v6 = vmul.f32 %v4915_v17, %v2886_v1 }
 0x7e9   :  { %v2949_v7 = vadd.f32 %v4919_v22, %v2916_v2  ;;  %v2917_v8 = vmul.f32 %v4915_v17, %v2884_v3 }
 0x7ea   :  { %2983 = vst [vmem:[%s5120_s10 + $0x50] sm:$0xff] %v2951_v4  ;;  %v2952_v5 = vadd.f32 %v4919_v22, %v2919_v6 }
 0x7eb   :  { %2981 = vst [vmem:[%s5120_s10 + $0x40] sm:$0xff] %v2949_v7  ;;  %v2950_v11 = vadd.f32 %v4919_v22, %v2917_v8 }
 0x7ec   :  { %2984 = vst [vmem:[%s5120_s10 + $0x58] sm:$0xff] %v2952_v5 }
 0x7ed   :  { %2982 = vst [vmem:[%s5120_s10 + $0x48] sm:$0xff] %v2950_v11 }
 0x7f1   :  { %v3650_v12 = vpop.f32.mrb[108].mxu0 }
 0x7f2   :  { %v2805_v14 = vadd.f32 %v3650_v12, %v4912_v13  ;;  %v2796_v15 = vpop.f32.mrb[109].mxu0 }
 0x7f3   :  { %v2797_v16 = vadd.f32 %v2796_v15, %v4912_v13  ;;  %v3651_v18 = vpop.f32.mrb[110].mxu0 }
 0x7f4   :  { %v2889_v19 = vmax.f32 %v2805_v14, 0.0  ;;  %v2808_v27 = vadd.f32 %v3651_v18, %v4912_v13  ;;  %v2799_v20 = vpop.f32.mrb[111].mxu0 }
 0x7f5   :  { %v2887_v21 = vmax.f32 %v2797_v16, 0.0  ;;  %v2800_v23 = vadd.f32 %v2799_v20, %v4912_v13 }
 0x7f6   :  { %v2922_v24 = vmul.f32 %v4915_v17, %v2889_v19  ;;  %v2890_v25 = vmax.f32 %v2808_v27, 0.0 }
 0x7f7   :  { %v2920_v26 = vmul.f32 %v4915_v17, %v2887_v21  ;;  %v2888_v28 = vmax.f32 %v2800_v23, 0.0 }
 0x7f8   :  { %v2955_v29 = vadd.f32 %v4919_v22, %v2922_v24  ;;  %v2923_v30 = vmul.f32 %v4915_v17, %v2890_v25 }
 0x7f9   :  { %v2953_v31 = vadd.f32 %v4919_v22, %v2920_v26  ;;  %v2921_v32 = vmul.f32 %v4915_v17, %v2888_v28 }
 0x7fa   :  { %2987 = vst [vmem:[%s5120_s10 + $0x70] sm:$0xff] %v2955_v29  ;;  %v2956_v33 = vadd.f32 %v4919_v22, %v2923_v30 }
 0x7fb   :  { %2985 = vst [vmem:[%s5120_s10 + $0x60] sm:$0xff] %v2953_v31  ;;  %v2954_v35 = vadd.f32 %v4919_v22, %v2921_v32 }
 0x7fc   :  { %2988 = vst [vmem:[%s5120_s10 + $0x78] sm:$0xff] %v2956_v33 }
 0x7fd   :  { %2986 = vst [vmem:[%s5120_s10 + $0x68] sm:$0xff] %v2954_v35 }
 0x801   :  { %v3654_v34 = vpop.f32.mrb[112].mxu0 }
 0x802   :  { %v2821_v41 = vadd.f32 %v3654_v34, %v4912_v13  ;;  %v2812_v36 = vpop.f32.mrb[113].mxu0 }
 0x803   :  { %v2813_v37 = vadd.f32 %v2812_v36, %v4912_v13  ;;  %v3655_v38 = vpop.f32.mrb[114].mxu0 }
 0x804   :  { %v2893_v39 = vmax.f32 %v2821_v41, 0.0  ;;  %v2824_v40 = vadd.f32 %v3655_v38, %v4912_v13  ;;  %v2815_v47 = vpop.f32.mrb[115].mxu0 }
 0x805   :  { %v2891_v42 = vmax.f32 %v2813_v37, 0.0  ;;  %v2816_v43 = vadd.f32 %v2815_v47, %v4912_v13 }
 0x806   :  { %v2926_v44 = vmul.f32 %v4915_v17, %v2893_v39  ;;  %v2894_v45 = vmax.f32 %v2824_v40, 0.0 }
 0x807   :  { %v2924_v46 = vmul.f32 %v4915_v17, %v2891_v42  ;;  %v2892_v52 = vmax.f32 %v2816_v43, 0.0 }
 0x808   :  { %v2959_v48 = vadd.f32 %v4919_v22, %v2926_v44  ;;  %v2927_v49 = vmul.f32 %v4915_v17, %v2894_v45 }
 0x809   :  { %v2957_v50 = vadd.f32 %v4919_v22, %v2924_v46  ;;  %v2925_v51 = vmul.f32 %v4915_v17, %v2892_v52 }
 0x80a   :  { %2991 = vst [vmem:[%s5120_s10 + $0x90] sm:$0xff] %v2959_v48  ;;  %v2960_v53 = vadd.f32 %v4919_v22, %v2927_v49 }
 0x80b   :  { %2989 = vst [vmem:[%s5120_s10 + $0x80] sm:$0xff] %v2957_v50  ;;  %v2958_v54 = vadd.f32 %v4919_v22, %v2925_v51 }
 0x80c   :  { %2992 = vst [vmem:[%s5120_s10 + $0x98] sm:$0xff] %v2960_v53 }
 0x80d   :  { %2990 = vst [vmem:[%s5120_s10 + $0x88] sm:$0xff] %v2958_v54 }
 0x811   :  { %v3658_v55 = vpop.f32.mrb[116].mxu0 }
 0x812   :  { %v2837_v56 = vadd.f32 %v3658_v55, %v4912_v13  ;;  %v2828_v58 = vpop.f32.mrb[117].mxu0 }
 0x813   :  { %v2829_v57 = vadd.f32 %v2828_v58, %v4912_v13  ;;  %v3659_v59 = vpop.f32.mrb[118].mxu0 }
 0x814   :  { %v2897_v60 = vmax.f32 %v2837_v56, 0.0  ;;  %v2840_v61 = vadd.f32 %v3659_v59, %v4912_v13  ;;  %v2831_v9 = vpop.f32.mrb[119].mxu0 }
 0x815   :  { %v2895_v62 = vmax.f32 %v2829_v57, 0.0  ;;  %v2832_v10 = vadd.f32 %v2831_v9, %v4912_v13 }
 0x816   :  { %v2930_v63 = vmul.f32 %v4915_v17, %v2897_v60  ;;  %v2898_v0 = vmax.f32 %v2840_v61, 0.0 }
 0x817   :  { %v2928_v1 = vmul.f32 %v4915_v17, %v2895_v62  ;;  %v2896_v2 = vmax.f32 %v2832_v10, 0.0 }
 0x818   :  { %v2963_v3 = vadd.f32 %v4919_v22, %v2930_v63  ;;  %v2931_v4 = vmul.f32 %v4915_v17, %v2898_v0 }
 0x819   :  { %v2961_v6 = vadd.f32 %v4919_v22, %v2928_v1  ;;  %v2929_v7 = vmul.f32 %v4915_v17, %v2896_v2 }
 0x81a   :  { %2995 = vst [vmem:[%s5120_s10 + $0xb0] sm:$0xff] %v2963_v3  ;;  %v2964_v8 = vadd.f32 %v4919_v22, %v2931_v4 }
 0x81b   :  { %2993 = vst [vmem:[%s5120_s10 + $0xa0] sm:$0xff] %v2961_v6  ;;  %v2962_v5 = vadd.f32 %v4919_v22, %v2929_v7 }
 0x81c   :  { %2996 = vst [vmem:[%s5120_s10 + $0xb8] sm:$0xff] %v2964_v8 }
 0x81d   :  { %2994 = vst [vmem:[%s5120_s10 + $0xa8] sm:$0xff] %v2962_v5 }
 0x821   :  { %v3662_v11 = vpop.f32.mrb[192].mxu1 }
 0x822   :  { %v2853_v12 = vadd.f32 %v3662_v11, %v4912_v13  ;;  %v2844_v14 = vpop.f32.mrb[193].mxu1 }
 0x823   :  { %v2845_v15 = vadd.f32 %v2844_v14, %v4912_v13  ;;  %v3663_v16 = vpop.f32.mrb[194].mxu1 }
 0x824   :  { %v2901_v18 = vmax.f32 %v2853_v12, 0.0  ;;  %v2856_v19 = vadd.f32 %v3663_v16, %v4912_v13  ;;  %v2847_v27 = vpop.f32.mrb[195].mxu1 }
 0x825   :  { %v2899_v20 = vmax.f32 %v2845_v15, 0.0  ;;  %v2848_v21 = vadd.f32 %v2847_v27, %v4912_v13 }
 0x826   :  { %v2934_v23 = vmul.f32 %v4915_v17, %v2901_v18  ;;  %v2902_v24 = vmax.f32 %v2856_v19, 0.0 }
 0x827   :  { %v2932_v25 = vmul.f32 %v4915_v17, %v2899_v20  ;;  %v2900_v26 = vmax.f32 %v2848_v21, 0.0 }
 0x828   :  { %v2967_v28 = vadd.f32 %v4919_v22, %v2934_v23  ;;  %v2935_v29 = vmul.f32 %v4915_v17, %v2902_v24 }
 0x829   :  { %v2965_v30 = vadd.f32 %v4919_v22, %v2932_v25  ;;  %v2933_v31 = vmul.f32 %v4915_v17, %v2900_v26 }
 0x82a   :  { %2999 = vst [vmem:[%s5120_s10 + $0xd0] sm:$0xff] %v2967_v28  ;;  %v2968_v32 = vadd.f32 %v4919_v22, %v2935_v29 }
 0x82b   :  { %2997 = vst [vmem:[%s5120_s10 + $0xc0] sm:$0xff] %v2965_v30  ;;  %v2966_v33 = vadd.f32 %v4919_v22, %v2933_v31 }
 0x82c   :  { %3000 = vst [vmem:[%s5120_s10 + $0xd8] sm:$0xff] %v2968_v32 }
 0x82d   :  { %2998 = vst [vmem:[%s5120_s10 + $0xc8] sm:$0xff] %v2966_v33 }
 0x831   :  { %v3666_v35 = vpop.f32.mrb[196].mxu1 }
 0x832   :  { %v2869_v34 = vadd.f32 %v3666_v35, %v4912_v13  ;;  %v2860_v41 = vpop.f32.mrb[197].mxu1 }
 0x833   :  { %v2861_v36 = vadd.f32 %v2860_v41, %v4912_v13  ;;  %v3667_v37 = vpop.f32.mrb[198].mxu1 }
 0x834   :  { %v2905_v38 = vmax.f32 %v2869_v34, 0.0  ;;  %v2872_v39 = vadd.f32 %v3667_v37, %v4912_v13  ;;  %v2863_v40 = vpop.f32.mrb[199].mxu1 }
 0x835   :  { %v2903_v47 = vmax.f32 %v2861_v36, 0.0  ;;  %v2864_v42 = vadd.f32 %v2863_v40, %v4912_v13 }
 0x836   :  { %v2938_v43 = vmul.f32 %v4915_v17, %v2905_v38  ;;  %v2906_v44 = vmax.f32 %v2872_v39, 0.0 }
 0x837   :  { %v2936_v45 = vmul.f32 %v4915_v17, %v2903_v47  ;;  %v2904_v46 = vmax.f32 %v2864_v42, 0.0 }
 0x838   :  { %v2971_v52 = vadd.f32 %v4919_v22, %v2938_v43  ;;  %v2939_v48 = vmul.f32 %v4915_v17, %v2906_v44 }
 0x839   :  { %v2969_v49 = vadd.f32 %v4919_v22, %v2936_v45  ;;  %v2937_v50 = vmul.f32 %v4915_v17, %v2904_v46 }
 0x83a   :  { %3003 = vst [vmem:[%s5120_s10 + $0xf0] sm:$0xff] %v2971_v52  ;;  %v2972_v13 = vadd.f32 %v4919_v22, %v2939_v48 }
 0x83b   :  { %3001 = vst [vmem:[%s5120_s10 + $0xe0] sm:$0xff] %v2969_v49  ;;  %v2970_v51 = vadd.f32 %v4919_v22, %v2937_v50 }
 0x83c   :  { %3004 = vst [vmem:[%s5120_s10 + $0xf8] sm:$0xff] %v2972_v13 }
 0x83d   :  { %3002 = vst [vmem:[%s5120_s10 + $0xe8] sm:$0xff] %v2970_v51 }
 0x83e   :  { %3009 = vsyncpa [#allocation3], 1 }

</bundles_post_ra>
